<compile_context>
chip_gen: v5e
topology: v5e:2x2
jax: 0.10.0
libtpu: 0.0.40
codegen_flags: <defaults>
</compile_context>

<pallas_src>
import math

import jax
import jax.numpy as jnp
from jax.experimental import pallas as pl
from jax.experimental.pallas import tpu as pltpu  # noqa: F401  (kept for CompilerParams if needed)

# ----------------------------- configuration --------------------------------
BATCH = 2
SEQ = 8
HIDDEN = 32
NUM_HEADS = 2
HEAD_DIM = HIDDEN // NUM_HEADS
INTERMEDIATE = 64
NUM_LAYERS = 4
VOCAB = 100
VOCAB_PAD = 128          # pad vocab to one full lane group for the one-hot gather
NUM_CLASSES = 3
LAYER_START = 1          # hidden_states[LAYER_START : LAYER_END + 1]
LAYER_END = 3
LN_EPS = 1e-12
LANE = 128               # lane-dense classifier output width (padded from NUM_CLASSES)


# ------------------------------ fused Pallas kernel ---------------------------
def _fused_berrrt_kernel(
    ids_ref, mask_ref, word_emb_ref, pos_tok_ref, eg_ref, eb_ref,
    wqkv_ref, bqkv_ref, wo_ref, bo_ref, ln1g_ref, ln1b_ref,
    w1_ref, b1_ref, w2_ref, b2_ref, ln2g_ref, ln2b_ref,
    wc_ref, bc_ref,
    out_ref,
):
    """Entire BERRRT forward (embedding -> 4 layers -> 'add' agg -> classifier)."""
    f32, bf16 = jnp.float32, jnp.bfloat16
    NB = NUM_HEADS * BATCH                      # batched-attention "n" dim (head-major)

    def ln(x, g, b):
        mu = jnp.mean(x, axis=-1, keepdims=True)
        var = jnp.mean(jnp.square(x - mu), axis=-1, keepdims=True)
        return (x - mu) * jax.lax.rsqrt(var + LN_EPS) * g + b

    def mxu(a, b):
        return jnp.dot(a, b, preferred_element_type=f32)

    def split_heads(x2d):
        # (B*S, HEAD_DIM*NH block) bf16 -> (NH*B, S, Dh); sublane-only reshapes,
        # lane slices stay within a single 128-lane vreg.
        cols = [x2d[:, hd * HEAD_DIM:(hd + 1) * HEAD_DIM] for hd in range(NUM_HEADS)]
        return jnp.concatenate(cols, axis=0).reshape(NB, SEQ, HEAD_DIM)

    def merge_heads(x3d):
        # (NH*B, S, Dh) -> (B*S, H), same head-major ordering as split_heads.
        x2d = x3d.reshape(NB * SEQ, HEAD_DIM)
        blocks = [x2d[hd * BATCH * SEQ:(hd + 1) * BATCH * SEQ, :]
                  for hd in range(NUM_HEADS)]
        return jnp.concatenate(blocks, axis=1)

    # --- embedding: exact one-hot gather on the MXU + position/token tables -----
    ids = ids_ref[...][:, :, None]                                        # (B, S, 1) i32
    iota = jax.lax.broadcasted_iota(jnp.int32, (BATCH, SEQ, VOCAB_PAD), 2)
    onehot = (iota == ids).astype(f32).reshape(BATCH * SEQ, VOCAB_PAD)
    word = mxu(onehot, word_emb_ref[...])                                 # (B*S, H) exact
    pos_tok = jnp.tile(pos_tok_ref[...], (BATCH, 1))                      # (B*S, H)
    h = ln(word + pos_tok, eg_ref[...], eb_ref[...])                      # (B*S, H) f32

    # additive key mask, built ONCE for all layers/heads: (NH*B, 1, S)
    am = (1.0 - mask_ref[...].astype(f32)) * -1e9                         # (B, S)
    am = jnp.tile(am, (NUM_HEADS, 1))[:, None, :]                         # (NH*B, 1, S)

    # CLS-row accumulator for the 'add' aggregation lives in vregs
    cls = jnp.zeros((BATCH, HIDDEN), f32)
    if LAYER_START == 0:                         # embedding output is selected
        cls = cls + h.reshape(BATCH, SEQ, HIDDEN)[:, 0, :]

    # --- transformer layers (statically unrolled, all weights VMEM-resident) ---
    for l in range(NUM_LAYERS):
        # fused QKV projection; 1/sqrt(head_dim) already folded into wq/bq
        qkv = mxu(h.astype(bf16), wqkv_ref[l]) + bqkv_ref[l]              # (B*S, 3H) f32
        qkvb = qkv.astype(bf16)                                           # one cast per layer
        q = split_heads(qkvb[:, :HIDDEN])
        k = split_heads(qkvb[:, HIDDEN:2 * HIDDEN])
        v = split_heads(qkvb[:, 2 * HIDDEN:])

        # one batched contraction for all (batch, head) pairs
        s = jnp.einsum('nqd,nkd->nqk', q, k, preferred_element_type=f32) + am
        s = s - jnp.max(s, axis=-1, keepdims=True)
        p = jnp.exp(s)
        p = p * pl.reciprocal(jnp.sum(p, axis=-1, keepdims=True), approx=True)
        ctx = merge_heads(jnp.einsum('nqk,nkd->nqd', p.astype(bf16), v,
                                     preferred_element_type=f32))         # (B*S, H) f32

        attn = mxu(ctx.astype(bf16), wo_ref[l]) + bo_ref[l]
        h1 = ln(attn + h, ln1g_ref[l], ln1b_ref[l])

        # TODO(synk): HF BERT uses exact erf-GELU; tanh approximation used here.
        inter = jax.nn.gelu(mxu(h1.astype(bf16), w1_ref[l]) + b1_ref[l],
                            approximate=True)
        ffn = mxu(inter.astype(bf16), w2_ref[l]) + b2_ref[l]
        h = ln(ffn + h1, ln2g_ref[l], ln2b_ref[l])

        if LAYER_START <= l + 1 <= LAYER_END:    # hidden_states[l+1] is selected
            cls = cls + h.reshape(BATCH, SEQ, HIDDEN)[:, 0, :]

    # 'add' aggregation summed in cls; dropout = identity (eval).
    # Classifier on the CLS token; lane-dense padded (B, 128) output.
    out_ref[...] = mxu(cls.astype(bf16), wc_ref[...]) + bc_ref[...]


# ------------------------------ parameters -----------------------------------
def init_params(key):
    std = 0.02
    keys = iter(jax.random.split(key, 256))

    def nrm(shape):
        return jax.random.normal(next(keys), shape, jnp.float32) * std

    params = {
        "word_emb": nrm((VOCAB, HIDDEN)),
        "pos_emb": nrm((SEQ, HIDDEN)),
        "tok_emb": nrm((2, HIDDEN)),
        "emb_ln_g": jnp.ones((HIDDEN,), jnp.float32),
        "emb_ln_b": jnp.zeros((HIDDEN,), jnp.float32),
        "cls_w": nrm((HIDDEN, NUM_CLASSES)),
        "cls_b": jnp.zeros((NUM_CLASSES,), jnp.float32),
        "layers": [],
    }
    for _ in range(NUM_LAYERS):
        params["layers"].append({
            "wq": nrm((HIDDEN, HIDDEN)), "bq": jnp.zeros((HIDDEN,), jnp.float32),
            "wk": nrm((HIDDEN, HIDDEN)), "bk": jnp.zeros((HIDDEN,), jnp.float32),
            "wv": nrm((HIDDEN, HIDDEN)), "bv": jnp.zeros((HIDDEN,), jnp.float32),
            "wo": nrm((HIDDEN, HIDDEN)), "bo": jnp.zeros((HIDDEN,), jnp.float32),
            "ln1_g": jnp.ones((HIDDEN,), jnp.float32), "ln1_b": jnp.zeros((HIDDEN,), jnp.float32),
            "w1": nrm((HIDDEN, INTERMEDIATE)), "b1": jnp.zeros((INTERMEDIATE,), jnp.float32),
            "w2": nrm((INTERMEDIATE, HIDDEN)), "b2": jnp.zeros((HIDDEN,), jnp.float32),
            "ln2_g": jnp.ones((HIDDEN,), jnp.float32), "ln2_b": jnp.zeros((HIDDEN,), jnp.float32),
        })
    return params


def build_fused_params(raw):
    """Stack per-layer weights, fuse QKV, fold attention scale, pad vocab/classifier."""
    scale = 1.0 / math.sqrt(HEAD_DIM)
    layers = raw["layers"]

    def stk(fn):
        return jnp.stack([fn(lp) for lp in layers], axis=0)

    return {
        # vocab table padded to 128 rows (lane-aligned one-hot gather), f32 for exactness
        "word_emb": jnp.zeros((VOCAB_PAD, HIDDEN), jnp.float32).at[:VOCAB].set(raw["word_emb"]),
        # position + (token-type 0) embedding, pre-summed
        "pos_tok": raw["pos_emb"] + raw["tok_emb"][0][None, :],
        "emb_ln_g": raw["emb_ln_g"].reshape(1, HIDDEN),
        "emb_ln_b": raw["emb_ln_b"].reshape(1, HIDDEN),
        # fused QKV weights (L, H, 3H); bf16 MXU operands; 1/sqrt(Dh) folded into Q
        "wqkv": stk(lambda p: jnp.concatenate(
            [p["wq"] * scale, p["wk"], p["wv"]], axis=1)).astype(jnp.bfloat16),
        "bqkv": stk(lambda p: jnp.concatenate(
            [p["bq"] * scale, p["bk"], p["bv"]])[None, :]),
        "wo": stk(lambda p: p["wo"]).astype(jnp.bfloat16),
        "bo": stk(lambda p: p["bo"][None, :]),
        "ln1_g": stk(lambda p: p["ln1_g"][None, :]),
        "ln1_b": stk(lambda p: p["ln1_b"][None, :]),
        "w1": stk(lambda p: p["w1"]).astype(jnp.bfloat16),
        "b1": stk(lambda p: p["b1"][None, :]),
        "w2": stk(lambda p: p["w2"]).astype(jnp.bfloat16),
        "b2": stk(lambda p: p["b2"][None, :]),
        "ln2_g": stk(lambda p: p["ln2_g"][None, :]),
        "ln2_b": stk(lambda p: p["ln2_b"][None, :]),
        # lane-dense classifier: pad NUM_CLASSES -> 128 output columns (zeros elsewhere)
        "cls_w": jnp.zeros((HIDDEN, LANE), jnp.float32)
                    .at[:, :NUM_CLASSES].set(raw["cls_w"]).astype(jnp.bfloat16),
        "cls_b": jnp.zeros((1, LANE), jnp.float32)
                    .at[0, :NUM_CLASSES].set(raw["cls_b"]),
    }


# ------------------------------ forward (single dispatch) ----------------------
@jax.jit
def berrrt_forward(fused, input_ids, attention_mask):
    # TODO(synk): on v7x (2 TensorCores) a grid=(2,) batch split with
    # dimension_semantics=("parallel",) would use the second core; kept gridless
    # here so v5e/v6e (1 TC) pay no extra sequential-step overhead.
    logits_pad = pl.pallas_call(
        _fused_berrrt_kernel,
        out_shape=jax.ShapeDtypeStruct((BATCH, LANE), jnp.float32),
    )(input_ids, attention_mask,
      fused["word_emb"], fused["pos_tok"], fused["emb_ln_g"], fused["emb_ln_b"],
      fused["wqkv"], fused["bqkv"], fused["wo"], fused["bo"],
      fused["ln1_g"], fused["ln1_b"],
      fused["w1"], fused["b1"], fused["w2"], fused["b2"],
      fused["ln2_g"], fused["ln2_b"],
      fused["cls_w"], fused["cls_b"])
    return logits_pad[:, :NUM_CLASSES]


# ---------------------------------- main ---------------------------------------
if __name__ == "__main__":
    key = jax.random.PRNGKey(0)
    k_param, k_ids = jax.random.split(key)

    raw_params = init_params(k_param)
    fused_params = build_fused_params(raw_params)

    input_ids = jax.random.randint(k_ids, (BATCH, SEQ), 0, VOCAB, dtype=jnp.int32)
    attention_mask = jnp.ones((BATCH, SEQ), jnp.int32).at[1, SEQ - 2:].set(0)  # pad tail of ex. 1

    logits = berrrt_forward(fused_params, input_ids, attention_mask)
    logits = jax.block_until_ready(logits)

    assert logits.shape == (BATCH, NUM_CLASSES)
    assert bool(jnp.all(jnp.isfinite(logits)))
    print("KERNEL_OK")
</pallas_src>

<mosaic_0001>
module attributes {stable_mosaic.version = 11 : i64} {
  func.func @_fused_berrrt_kernel(%arg0: memref<2x8xi32, #tpu.memory_space<vmem>>, %arg1: memref<2x8xi32, #tpu.memory_space<vmem>>, %arg2: memref<128x32xf32, #tpu.memory_space<vmem>>, %arg3: memref<8x32xf32, #tpu.memory_space<vmem>>, %arg4: memref<1x32xf32, #tpu.memory_space<vmem>>, %arg5: memref<1x32xf32, #tpu.memory_space<vmem>>, %arg6: memref<4x32x96xbf16, #tpu.memory_space<vmem>>, %arg7: memref<4x1x96xf32, #tpu.memory_space<vmem>>, %arg8: memref<4x32x32xbf16, #tpu.memory_space<vmem>>, %arg9: memref<4x1x32xf32, #tpu.memory_space<vmem>>, %arg10: memref<4x1x32xf32, #tpu.memory_space<vmem>>, %arg11: memref<4x1x32xf32, #tpu.memory_space<vmem>>, %arg12: memref<4x32x64xbf16, #tpu.memory_space<vmem>>, %arg13: memref<4x1x64xf32, #tpu.memory_space<vmem>>, %arg14: memref<4x64x32xbf16, #tpu.memory_space<vmem>>, %arg15: memref<4x1x32xf32, #tpu.memory_space<vmem>>, %arg16: memref<4x1x32xf32, #tpu.memory_space<vmem>>, %arg17: memref<4x1x32xf32, #tpu.memory_space<vmem>>, %arg18: memref<32x128xbf16, #tpu.memory_space<vmem>>, %arg19: memref<1x128xf32, #tpu.memory_space<vmem>>, %arg20: memref<2x128xf32, #tpu.memory_space<vmem>>) attributes {dimension_semantics = [], scalar_prefetch = 0 : i64, scratch_operands = 0 : i64, tpu.core_type = #tpu.core_type<tc>} {
    %c0 = arith.constant 0 : index
    %c0_0 = arith.constant 0 : index
    %0 = vector.load %arg0[%c0, %c0_0] : memref<2x8xi32, #tpu.memory_space<vmem>>, vector<2x8xi32>
    %1 = vector.shape_cast %0 : vector<2x8xi32> to vector<2x8x1xi32>
    %2 = tpu.iota {dimensions = array<i32: 2>} : vector<2x8x128xi32>
    %3 = vector.broadcast %1 : vector<2x8x1xi32> to vector<2x8x128xi32>
    %4 = arith.cmpi eq, %2, %3 : vector<2x8x128xi32>
    %5 = arith.extui %4 : vector<2x8x128xi1> to vector<2x8x128xi32>
    %6 = arith.sitofp %5 : vector<2x8x128xi32> to vector<2x8x128xf32>
    %7 = vector.shape_cast %6 : vector<2x8x128xf32> to vector<16x128xf32>
    %c0_1 = arith.constant 0 : index
    %c0_2 = arith.constant 0 : index
    %8 = vector.load %arg2[%c0_1, %c0_2] : memref<128x32xf32, #tpu.memory_space<vmem>>, vector<128x32xf32>
    %cst = arith.constant dense<0.000000e+00> : vector<16x32xf32>
    %9 = tpu.matmul %7, %8, %cst {dimension_numbers = #tpu.dot_dimension_numbers<[1], [0], [0], [1], [0, 0, 1, 1], [], []>} : vector<16x128xf32>, vector<128x32xf32>, vector<16x32xf32> -> vector<16x32xf32>
    %c0_3 = arith.constant 0 : index
    %c0_4 = arith.constant 0 : index
    %10 = vector.load %arg3[%c0_3, %c0_4] : memref<8x32xf32, #tpu.memory_space<vmem>>, vector<8x32xf32>
    %11 = tpu.concatenate %10, %10 in 0 : vector<8x32xf32>, vector<8x32xf32> -> vector<16x32xf32>
    %12 = arith.addf %9, %11 : vector<16x32xf32>
    %c0_5 = arith.constant 0 : index
    %c0_6 = arith.constant 0 : index
    %13 = vector.load %arg4[%c0_5, %c0_6] : memref<1x32xf32, #tpu.memory_space<vmem>>, vector<1x32xf32>
    %c0_7 = arith.constant 0 : index
    %c0_8 = arith.constant 0 : index
    %14 = vector.load %arg5[%c0_7, %c0_8] : memref<1x32xf32, #tpu.memory_space<vmem>>, vector<1x32xf32>
    %cst_9 = arith.constant dense<0.000000e+00> : vector<16xf32>
    %15 = vector.multi_reduction <add>, %12, %cst_9 [1] : vector<16x32xf32> to vector<16xf32>
    %16 = vector.shape_cast %15 : vector<16xf32> to vector<16x1xf32>
    %cst_10 = arith.constant 3.200000e+01 : f32
    %17 = vector.broadcast %cst_10 : f32 to vector<16x1xf32>
    %18 = arith.divf %16, %17 : vector<16x1xf32>
    %19 = vector.broadcast %18 : vector<16x1xf32> to vector<16x32xf32>
    %20 = arith.subf %12, %19 : vector<16x32xf32>
    %21 = arith.mulf %20, %20 : vector<16x32xf32>
    %cst_11 = arith.constant dense<0.000000e+00> : vector<16xf32>
    %22 = vector.multi_reduction <add>, %21, %cst_11 [1] : vector<16x32xf32> to vector<16xf32>
    %23 = vector.shape_cast %22 : vector<16xf32> to vector<16x1xf32>
    %cst_12 = arith.constant 3.200000e+01 : f32
    %24 = vector.broadcast %cst_12 : f32 to vector<16x1xf32>
    %25 = arith.divf %23, %24 : vector<16x1xf32>
    %26 = vector.broadcast %18 : vector<16x1xf32> to vector<16x32xf32>
    %27 = arith.subf %12, %26 : vector<16x32xf32>
    %cst_13 = arith.constant 9.99999996E-13 : f32
    %28 = vector.broadcast %cst_13 : f32 to vector<16x1xf32>
    %29 = arith.addf %25, %28 : vector<16x1xf32>
    %30 = math.rsqrt %29 : vector<16x1xf32>
    %31 = vector.broadcast %30 : vector<16x1xf32> to vector<16x32xf32>
    %32 = arith.mulf %27, %31 : vector<16x32xf32>
    %33 = vector.broadcast %13 : vector<1x32xf32> to vector<16x32xf32>
    %34 = arith.mulf %32, %33 : vector<16x32xf32>
    %35 = vector.broadcast %14 : vector<1x32xf32> to vector<16x32xf32>
    %36 = arith.addf %34, %35 : vector<16x32xf32>
    %c0_14 = arith.constant 0 : index
    %c0_15 = arith.constant 0 : index
    %37 = vector.load %arg1[%c0_14, %c0_15] : memref<2x8xi32, #tpu.memory_space<vmem>>, vector<2x8xi32>
    %38 = arith.sitofp %37 : vector<2x8xi32> to vector<2x8xf32>
    %cst_16 = arith.constant 1.000000e+00 : f32
    %39 = vector.broadcast %cst_16 : f32 to vector<2x8xf32>
    %40 = arith.subf %39, %38 : vector<2x8xf32>
    %cst_17 = arith.constant -1.000000e+09 : f32
    %41 = vector.broadcast %cst_17 : f32 to vector<2x8xf32>
    %42 = arith.mulf %40, %41 : vector<2x8xf32>
    %43 = tpu.concatenate %42, %42 in 0 : vector<2x8xf32>, vector<2x8xf32> -> vector<4x8xf32>
    %44 = vector.shape_cast %43 : vector<4x8xf32> to vector<4x1x8xf32>
    %cst_18 = arith.constant 0.000000e+00 : f32
    %45 = vector.broadcast %cst_18 : f32 to vector<2x32xf32>
    %46 = arith.truncf %36 : vector<16x32xf32> to vector<16x32xbf16>
    %c0_19 = arith.constant 0 : index
    %c0_20 = arith.constant 0 : index
    %c0_21 = arith.constant 0 : index
    %47 = vector.load %arg6[%c0_19, %c0_20, %c0_21] : memref<4x32x96xbf16, #tpu.memory_space<vmem>>, vector<1x32x96xbf16>
    %48 = vector.shape_cast %47 : vector<1x32x96xbf16> to vector<32x96xbf16>
    %cst_22 = arith.constant dense<0.000000e+00> : vector<16x96xf32>
    %49 = tpu.matmul %46, %48, %cst_22 {dimension_numbers = #tpu.dot_dimension_numbers<[1], [0], [0], [1], [0, 0, 1, 1], [], []>} : vector<16x32xbf16>, vector<32x96xbf16>, vector<16x96xf32> -> vector<16x96xf32>
    %c0_23 = arith.constant 0 : index
    %c0_24 = arith.constant 0 : index
    %c0_25 = arith.constant 0 : index
    %50 = vector.load %arg7[%c0_23, %c0_24, %c0_25] : memref<4x1x96xf32, #tpu.memory_space<vmem>>, vector<1x1x96xf32>
    %51 = vector.shape_cast %50 : vector<1x1x96xf32> to vector<1x96xf32>
    %52 = vector.broadcast %51 : vector<1x96xf32> to vector<16x96xf32>
    %53 = arith.addf %49, %52 : vector<16x96xf32>
    %54 = arith.truncf %53 : vector<16x96xf32> to vector<16x96xbf16>
    %55 = vector.extract_strided_slice %54 {offsets = [0, 0], sizes = [16, 32], strides = [1, 1]} : vector<16x96xbf16> to vector<16x32xbf16>
    %56 = vector.extract_strided_slice %55 {offsets = [0, 0], sizes = [16, 16], strides = [1, 1]} : vector<16x32xbf16> to vector<16x16xbf16>
    %57 = vector.extract_strided_slice %55 {offsets = [0, 16], sizes = [16, 16], strides = [1, 1]} : vector<16x32xbf16> to vector<16x16xbf16>
    %58 = tpu.concatenate %56, %57 in 0 : vector<16x16xbf16>, vector<16x16xbf16> -> vector<32x16xbf16>
    %59 = vector.shape_cast %58 : vector<32x16xbf16> to vector<4x8x16xbf16>
    %60 = vector.extract_strided_slice %54 {offsets = [0, 32], sizes = [16, 32], strides = [1, 1]} : vector<16x96xbf16> to vector<16x32xbf16>
    %61 = vector.extract_strided_slice %60 {offsets = [0, 0], sizes = [16, 16], strides = [1, 1]} : vector<16x32xbf16> to vector<16x16xbf16>
    %62 = vector.extract_strided_slice %60 {offsets = [0, 16], sizes = [16, 16], strides = [1, 1]} : vector<16x32xbf16> to vector<16x16xbf16>
    %63 = tpu.concatenate %61, %62 in 0 : vector<16x16xbf16>, vector<16x16xbf16> -> vector<32x16xbf16>
    %64 = vector.shape_cast %63 : vector<32x16xbf16> to vector<4x8x16xbf16>
    %65 = vector.extract_strided_slice %54 {offsets = [0, 64], sizes = [16, 32], strides = [1, 1]} : vector<16x96xbf16> to vector<16x32xbf16>
    %66 = vector.extract_strided_slice %65 {offsets = [0, 0], sizes = [16, 16], strides = [1, 1]} : vector<16x32xbf16> to vector<16x16xbf16>
    %67 = vector.extract_strided_slice %65 {offsets = [0, 16], sizes = [16, 16], strides = [1, 1]} : vector<16x32xbf16> to vector<16x16xbf16>
    %68 = tpu.concatenate %66, %67 in 0 : vector<16x16xbf16>, vector<16x16xbf16> -> vector<32x16xbf16>
    %69 = vector.shape_cast %68 : vector<32x16xbf16> to vector<4x8x16xbf16>
    "tpu.trace_start"() <{level = 10 : i32, message = "nqd,nkd->nqk"}> : () -> ()
    %cst_26 = arith.constant dense<0.000000e+00> : vector<4x8x8xf32>
    %70 = tpu.matmul %59, %64, %cst_26 {dimension_numbers = #tpu.dot_dimension_numbers<[2], [2], [1], [1], [0, 0, 0, 1, 1, 1], [0], [0]>} : vector<4x8x16xbf16>, vector<4x8x16xbf16>, vector<4x8x8xf32> -> vector<4x8x8xf32>
    "tpu.trace_stop"() : () -> ()
    %71 = vector.broadcast %44 : vector<4x1x8xf32> to vector<4x8x8xf32>
    %72 = arith.addf %70, %71 : vector<4x8x8xf32>
    %cst_27 = arith.constant dense<0xFF800000> : vector<4x8xf32>
    %73 = vector.multi_reduction <maximumf>, %72, %cst_27 [2] : vector<4x8x8xf32> to vector<4x8xf32>
    %74 = vector.shape_cast %73 : vector<4x8xf32> to vector<4x8x1xf32>
    %75 = vector.broadcast %74 : vector<4x8x1xf32> to vector<4x8x8xf32>
    %76 = arith.subf %72, %75 : vector<4x8x8xf32>
    %77 = math.exp %76 : vector<4x8x8xf32>
    %cst_28 = arith.constant dense<0.000000e+00> : vector<4x8xf32>
    %78 = vector.multi_reduction <add>, %77, %cst_28 [2] : vector<4x8x8xf32> to vector<4x8xf32>
    %79 = vector.shape_cast %78 : vector<4x8xf32> to vector<4x8x1xf32>
    %80 = tpu.reciprocal %79 {approx = true} : vector<4x8x1xf32> -> vector<4x8x1xf32>
    %81 = vector.broadcast %80 : vector<4x8x1xf32> to vector<4x8x8xf32>
    %82 = arith.mulf %77, %81 : vector<4x8x8xf32>
    %83 = arith.truncf %82 : vector<4x8x8xf32> to vector<4x8x8xbf16>
    "tpu.trace_start"() <{level = 10 : i32, message = "nqk,nkd->nqd"}> : () -> ()
    %cst_29 = arith.constant dense<0.000000e+00> : vector<4x8x16xf32>
    %84 = tpu.matmul %83, %69, %cst_29 {dimension_numbers = #tpu.dot_dimension_numbers<[2], [1], [1], [2], [0, 0, 0, 1, 1, 2], [0], [0]>} : vector<4x8x8xbf16>, vector<4x8x16xbf16>, vector<4x8x16xf32> -> vector<4x8x16xf32>
    "tpu.trace_stop"() : () -> ()
    %85 = vector.shape_cast %84 : vector<4x8x16xf32> to vector<32x16xf32>
    %86 = vector.extract_strided_slice %85 {offsets = [0, 0], sizes = [16, 16], strides = [1, 1]} : vector<32x16xf32> to vector<16x16xf32>
    %87 = vector.extract_strided_slice %85 {offsets = [16, 0], sizes = [16, 16], strides = [1, 1]} : vector<32x16xf32> to vector<16x16xf32>
    %88 = tpu.concatenate %86, %87 in 1 : vector<16x16xf32>, vector<16x16xf32> -> vector<16x32xf32>
    %89 = arith.truncf %88 : vector<16x32xf32> to vector<16x32xbf16>
    %c0_30 = arith.constant 0 : index
    %c0_31 = arith.constant 0 : index
    %c0_32 = arith.constant 0 : index
    %90 = vector.load %arg8[%c0_30, %c0_31, %c0_32] : memref<4x32x32xbf16, #tpu.memory_space<vmem>>, vector<1x32x32xbf16>
    %91 = vector.shape_cast %90 : vector<1x32x32xbf16> to vector<32x32xbf16>
    %cst_33 = arith.constant dense<0.000000e+00> : vector<16x32xf32>
    %92 = tpu.matmul %89, %91, %cst_33 {dimension_numbers = #tpu.dot_dimension_numbers<[1], [0], [0], [1], [0, 0, 1, 1], [], []>} : vector<16x32xbf16>, vector<32x32xbf16>, vector<16x32xf32> -> vector<16x32xf32>
    %c0_34 = arith.constant 0 : index
    %c0_35 = arith.constant 0 : index
    %c0_36 = arith.constant 0 : index
    %93 = vector.load %arg9[%c0_34, %c0_35, %c0_36] : memref<4x1x32xf32, #tpu.memory_space<vmem>>, vector<1x1x32xf32>
    %94 = vector.shape_cast %93 : vector<1x1x32xf32> to vector<1x32xf32>
    %95 = vector.broadcast %94 : vector<1x32xf32> to vector<16x32xf32>
    %96 = arith.addf %92, %95 : vector<16x32xf32>
    %97 = arith.addf %96, %36 : vector<16x32xf32>
    %c0_37 = arith.constant 0 : index
    %c0_38 = arith.constant 0 : index
    %c0_39 = arith.constant 0 : index
    %98 = vector.load %arg10[%c0_37, %c0_38, %c0_39] : memref<4x1x32xf32, #tpu.memory_space<vmem>>, vector<1x1x32xf32>
    %99 = vector.shape_cast %98 : vector<1x1x32xf32> to vector<1x32xf32>
    %c0_40 = arith.constant 0 : index
    %c0_41 = arith.constant 0 : index
    %c0_42 = arith.constant 0 : index
    %100 = vector.load %arg11[%c0_40, %c0_41, %c0_42] : memref<4x1x32xf32, #tpu.memory_space<vmem>>, vector<1x1x32xf32>
    %101 = vector.shape_cast %100 : vector<1x1x32xf32> to vector<1x32xf32>
    %cst_43 = arith.constant dense<0.000000e+00> : vector<16xf32>
    %102 = vector.multi_reduction <add>, %97, %cst_43 [1] : vector<16x32xf32> to vector<16xf32>
    %103 = vector.shape_cast %102 : vector<16xf32> to vector<16x1xf32>
    %cst_44 = arith.constant 3.200000e+01 : f32
    %104 = vector.broadcast %cst_44 : f32 to vector<16x1xf32>
    %105 = arith.divf %103, %104 : vector<16x1xf32>
    %106 = vector.broadcast %105 : vector<16x1xf32> to vector<16x32xf32>
    %107 = arith.subf %97, %106 : vector<16x32xf32>
    %108 = arith.mulf %107, %107 : vector<16x32xf32>
    %cst_45 = arith.constant dense<0.000000e+00> : vector<16xf32>
    %109 = vector.multi_reduction <add>, %108, %cst_45 [1] : vector<16x32xf32> to vector<16xf32>
    %110 = vector.shape_cast %109 : vector<16xf32> to vector<16x1xf32>
    %cst_46 = arith.constant 3.200000e+01 : f32
    %111 = vector.broadcast %cst_46 : f32 to vector<16x1xf32>
    %112 = arith.divf %110, %111 : vector<16x1xf32>
    %113 = vector.broadcast %105 : vector<16x1xf32> to vector<16x32xf32>
    %114 = arith.subf %97, %113 : vector<16x32xf32>
    %cst_47 = arith.constant 9.99999996E-13 : f32
    %115 = vector.broadcast %cst_47 : f32 to vector<16x1xf32>
    %116 = arith.addf %112, %115 : vector<16x1xf32>
    %117 = math.rsqrt %116 : vector<16x1xf32>
    %118 = vector.broadcast %117 : vector<16x1xf32> to vector<16x32xf32>
    %119 = arith.mulf %114, %118 : vector<16x32xf32>
    %120 = vector.broadcast %99 : vector<1x32xf32> to vector<16x32xf32>
    %121 = arith.mulf %119, %120 : vector<16x32xf32>
    %122 = vector.broadcast %101 : vector<1x32xf32> to vector<16x32xf32>
    %123 = arith.addf %121, %122 : vector<16x32xf32>
    %124 = arith.truncf %123 : vector<16x32xf32> to vector<16x32xbf16>
    %c0_48 = arith.constant 0 : index
    %c0_49 = arith.constant 0 : index
    %c0_50 = arith.constant 0 : index
    %125 = vector.load %arg12[%c0_48, %c0_49, %c0_50] : memref<4x32x64xbf16, #tpu.memory_space<vmem>>, vector<1x32x64xbf16>
    %126 = vector.shape_cast %125 : vector<1x32x64xbf16> to vector<32x64xbf16>
    %cst_51 = arith.constant dense<0.000000e+00> : vector<16x64xf32>
    %127 = tpu.matmul %124, %126, %cst_51 {dimension_numbers = #tpu.dot_dimension_numbers<[1], [0], [0], [1], [0, 0, 1, 1], [], []>} : vector<16x32xbf16>, vector<32x64xbf16>, vector<16x64xf32> -> vector<16x64xf32>
    %c0_52 = arith.constant 0 : index
    %c0_53 = arith.constant 0 : index
    %c0_54 = arith.constant 0 : index
    %128 = vector.load %arg13[%c0_52, %c0_53, %c0_54] : memref<4x1x64xf32, #tpu.memory_space<vmem>>, vector<1x1x64xf32>
    %129 = vector.shape_cast %128 : vector<1x1x64xf32> to vector<1x64xf32>
    %130 = vector.broadcast %129 : vector<1x64xf32> to vector<16x64xf32>
    %131 = arith.addf %127, %130 : vector<16x64xf32>
    %132 = arith.mulf %131, %131 : vector<16x64xf32>
    %133 = arith.mulf %131, %132 : vector<16x64xf32>
    %cst_55 = arith.constant 4.471500e-02 : f32
    %134 = vector.broadcast %cst_55 : f32 to vector<16x64xf32>
    %135 = arith.mulf %134, %133 : vector<16x64xf32>
    %136 = arith.addf %131, %135 : vector<16x64xf32>
    %cst_56 = arith.constant 0.797884583 : f32
    %137 = vector.broadcast %cst_56 : f32 to vector<16x64xf32>
    %138 = arith.mulf %137, %136 : vector<16x64xf32>
    %139 = math.tanh %138 : vector<16x64xf32>
    %cst_57 = arith.constant 1.000000e+00 : f32
    %140 = vector.broadcast %cst_57 : f32 to vector<16x64xf32>
    %141 = arith.addf %140, %139 : vector<16x64xf32>
    %cst_58 = arith.constant 5.000000e-01 : f32
    %142 = vector.broadcast %cst_58 : f32 to vector<16x64xf32>
    %143 = arith.mulf %142, %141 : vector<16x64xf32>
    %144 = arith.mulf %131, %143 : vector<16x64xf32>
    %145 = arith.truncf %144 : vector<16x64xf32> to vector<16x64xbf16>
    %c0_59 = arith.constant 0 : index
    %c0_60 = arith.constant 0 : index
    %c0_61 = arith.constant 0 : index
    %146 = vector.load %arg14[%c0_59, %c0_60, %c0_61] : memref<4x64x32xbf16, #tpu.memory_space<vmem>>, vector<1x64x32xbf16>
    %147 = vector.shape_cast %146 : vector<1x64x32xbf16> to vector<64x32xbf16>
    %cst_62 = arith.constant dense<0.000000e+00> : vector<16x32xf32>
    %148 = tpu.matmul %145, %147, %cst_62 {dimension_numbers = #tpu.dot_dimension_numbers<[1], [0], [0], [1], [0, 0, 1, 1], [], []>} : vector<16x64xbf16>, vector<64x32xbf16>, vector<16x32xf32> -> vector<16x32xf32>
    %c0_63 = arith.constant 0 : index
    %c0_64 = arith.constant 0 : index
    %c0_65 = arith.constant 0 : index
    %149 = vector.load %arg15[%c0_63, %c0_64, %c0_65] : memref<4x1x32xf32, #tpu.memory_space<vmem>>, vector<1x1x32xf32>
    %150 = vector.shape_cast %149 : vector<1x1x32xf32> to vector<1x32xf32>
    %151 = vector.broadcast %150 : vector<1x32xf32> to vector<16x32xf32>
    %152 = arith.addf %148, %151 : vector<16x32xf32>
    %153 = arith.addf %152, %123 : vector<16x32xf32>
    %c0_66 = arith.constant 0 : index
    %c0_67 = arith.constant 0 : index
    %c0_68 = arith.constant 0 : index
    %154 = vector.load %arg16[%c0_66, %c0_67, %c0_68] : memref<4x1x32xf32, #tpu.memory_space<vmem>>, vector<1x1x32xf32>
    %155 = vector.shape_cast %154 : vector<1x1x32xf32> to vector<1x32xf32>
    %c0_69 = arith.constant 0 : index
    %c0_70 = arith.constant 0 : index
    %c0_71 = arith.constant 0 : index
    %156 = vector.load %arg17[%c0_69, %c0_70, %c0_71] : memref<4x1x32xf32, #tpu.memory_space<vmem>>, vector<1x1x32xf32>
    %157 = vector.shape_cast %156 : vector<1x1x32xf32> to vector<1x32xf32>
    %cst_72 = arith.constant dense<0.000000e+00> : vector<16xf32>
    %158 = vector.multi_reduction <add>, %153, %cst_72 [1] : vector<16x32xf32> to vector<16xf32>
    %159 = vector.shape_cast %158 : vector<16xf32> to vector<16x1xf32>
    %cst_73 = arith.constant 3.200000e+01 : f32
    %160 = vector.broadcast %cst_73 : f32 to vector<16x1xf32>
    %161 = arith.divf %159, %160 : vector<16x1xf32>
    %162 = vector.broadcast %161 : vector<16x1xf32> to vector<16x32xf32>
    %163 = arith.subf %153, %162 : vector<16x32xf32>
    %164 = arith.mulf %163, %163 : vector<16x32xf32>
    %cst_74 = arith.constant dense<0.000000e+00> : vector<16xf32>
    %165 = vector.multi_reduction <add>, %164, %cst_74 [1] : vector<16x32xf32> to vector<16xf32>
    %166 = vector.shape_cast %165 : vector<16xf32> to vector<16x1xf32>
    %cst_75 = arith.constant 3.200000e+01 : f32
    %167 = vector.broadcast %cst_75 : f32 to vector<16x1xf32>
    %168 = arith.divf %166, %167 : vector<16x1xf32>
    %169 = vector.broadcast %161 : vector<16x1xf32> to vector<16x32xf32>
    %170 = arith.subf %153, %169 : vector<16x32xf32>
    %cst_76 = arith.constant 9.99999996E-13 : f32
    %171 = vector.broadcast %cst_76 : f32 to vector<16x1xf32>
    %172 = arith.addf %168, %171 : vector<16x1xf32>
    %173 = math.rsqrt %172 : vector<16x1xf32>
    %174 = vector.broadcast %173 : vector<16x1xf32> to vector<16x32xf32>
    %175 = arith.mulf %170, %174 : vector<16x32xf32>
    %176 = vector.broadcast %155 : vector<1x32xf32> to vector<16x32xf32>
    %177 = arith.mulf %175, %176 : vector<16x32xf32>
    %178 = vector.broadcast %157 : vector<1x32xf32> to vector<16x32xf32>
    %179 = arith.addf %177, %178 : vector<16x32xf32>
    %180 = vector.shape_cast %179 : vector<16x32xf32> to vector<2x8x32xf32>
    %181 = vector.extract_strided_slice %180 {offsets = [0, 0, 0], sizes = [2, 1, 32], strides = [1, 1, 1]} : vector<2x8x32xf32> to vector<2x1x32xf32>
    %182 = vector.shape_cast %181 : vector<2x1x32xf32> to vector<2x32xf32>
    %183 = arith.addf %45, %182 : vector<2x32xf32>
    %184 = arith.truncf %179 : vector<16x32xf32> to vector<16x32xbf16>
    %c1 = arith.constant 1 : index
    %c0_77 = arith.constant 0 : index
    %c0_78 = arith.constant 0 : index
    %185 = vector.load %arg6[%c1, %c0_77, %c0_78] : memref<4x32x96xbf16, #tpu.memory_space<vmem>>, vector<1x32x96xbf16>
    %186 = vector.shape_cast %185 : vector<1x32x96xbf16> to vector<32x96xbf16>
    %cst_79 = arith.constant dense<0.000000e+00> : vector<16x96xf32>
    %187 = tpu.matmul %184, %186, %cst_79 {dimension_numbers = #tpu.dot_dimension_numbers<[1], [0], [0], [1], [0, 0, 1, 1], [], []>} : vector<16x32xbf16>, vector<32x96xbf16>, vector<16x96xf32> -> vector<16x96xf32>
    %c1_80 = arith.constant 1 : index
    %c0_81 = arith.constant 0 : index
    %c0_82 = arith.constant 0 : index
    %188 = vector.load %arg7[%c1_80, %c0_81, %c0_82] : memref<4x1x96xf32, #tpu.memory_space<vmem>>, vector<1x1x96xf32>
    %189 = vector.shape_cast %188 : vector<1x1x96xf32> to vector<1x96xf32>
    %190 = vector.broadcast %189 : vector<1x96xf32> to vector<16x96xf32>
    %191 = arith.addf %187, %190 : vector<16x96xf32>
    %192 = arith.truncf %191 : vector<16x96xf32> to vector<16x96xbf16>
    %193 = vector.extract_strided_slice %192 {offsets = [0, 0], sizes = [16, 32], strides = [1, 1]} : vector<16x96xbf16> to vector<16x32xbf16>
    %194 = vector.extract_strided_slice %193 {offsets = [0, 0], sizes = [16, 16], strides = [1, 1]} : vector<16x32xbf16> to vector<16x16xbf16>
    %195 = vector.extract_strided_slice %193 {offsets = [0, 16], sizes = [16, 16], strides = [1, 1]} : vector<16x32xbf16> to vector<16x16xbf16>
    %196 = tpu.concatenate %194, %195 in 0 : vector<16x16xbf16>, vector<16x16xbf16> -> vector<32x16xbf16>
    %197 = vector.shape_cast %196 : vector<32x16xbf16> to vector<4x8x16xbf16>
    %198 = vector.extract_strided_slice %192 {offsets = [0, 32], sizes = [16, 32], strides = [1, 1]} : vector<16x96xbf16> to vector<16x32xbf16>
    %199 = vector.extract_strided_slice %198 {offsets = [0, 0], sizes = [16, 16], strides = [1, 1]} : vector<16x32xbf16> to vector<16x16xbf16>
    %200 = vector.extract_strided_slice %198 {offsets = [0, 16], sizes = [16, 16], strides = [1, 1]} : vector<16x32xbf16> to vector<16x16xbf16>
    %201 = tpu.concatenate %199, %200 in 0 : vector<16x16xbf16>, vector<16x16xbf16> -> vector<32x16xbf16>
    %202 = vector.shape_cast %201 : vector<32x16xbf16> to vector<4x8x16xbf16>
    %203 = vector.extract_strided_slice %192 {offsets = [0, 64], sizes = [16, 32], strides = [1, 1]} : vector<16x96xbf16> to vector<16x32xbf16>
    %204 = vector.extract_strided_slice %203 {offsets = [0, 0], sizes = [16, 16], strides = [1, 1]} : vector<16x32xbf16> to vector<16x16xbf16>
    %205 = vector.extract_strided_slice %203 {offsets = [0, 16], sizes = [16, 16], strides = [1, 1]} : vector<16x32xbf16> to vector<16x16xbf16>
    %206 = tpu.concatenate %204, %205 in 0 : vector<16x16xbf16>, vector<16x16xbf16> -> vector<32x16xbf16>
    %207 = vector.shape_cast %206 : vector<32x16xbf16> to vector<4x8x16xbf16>
    "tpu.trace_start"() <{level = 10 : i32, message = "nqd,nkd->nqk"}> : () -> ()
    %cst_83 = arith.constant dense<0.000000e+00> : vector<4x8x8xf32>
    %208 = tpu.matmul %197, %202, %cst_83 {dimension_numbers = #tpu.dot_dimension_numbers<[2], [2], [1], [1], [0, 0, 0, 1, 1, 1], [0], [0]>} : vector<4x8x16xbf16>, vector<4x8x16xbf16>, vector<4x8x8xf32> -> vector<4x8x8xf32>
    "tpu.trace_stop"() : () -> ()
    %209 = vector.broadcast %44 : vector<4x1x8xf32> to vector<4x8x8xf32>
    %210 = arith.addf %208, %209 : vector<4x8x8xf32>
    %cst_84 = arith.constant dense<0xFF800000> : vector<4x8xf32>
    %211 = vector.multi_reduction <maximumf>, %210, %cst_84 [2] : vector<4x8x8xf32> to vector<4x8xf32>
    %212 = vector.shape_cast %211 : vector<4x8xf32> to vector<4x8x1xf32>
    %213 = vector.broadcast %212 : vector<4x8x1xf32> to vector<4x8x8xf32>
    %214 = arith.subf %210, %213 : vector<4x8x8xf32>
    %215 = math.exp %214 : vector<4x8x8xf32>
    %cst_85 = arith.constant dense<0.000000e+00> : vector<4x8xf32>
    %216 = vector.multi_reduction <add>, %215, %cst_85 [2] : vector<4x8x8xf32> to vector<4x8xf32>
    %217 = vector.shape_cast %216 : vector<4x8xf32> to vector<4x8x1xf32>
    %218 = tpu.reciprocal %217 {approx = true} : vector<4x8x1xf32> -> vector<4x8x1xf32>
    %219 = vector.broadcast %218 : vector<4x8x1xf32> to vector<4x8x8xf32>
    %220 = arith.mulf %215, %219 : vector<4x8x8xf32>
    %221 = arith.truncf %220 : vector<4x8x8xf32> to vector<4x8x8xbf16>
    "tpu.trace_start"() <{level = 10 : i32, message = "nqk,nkd->nqd"}> : () -> ()
    %cst_86 = arith.constant dense<0.000000e+00> : vector<4x8x16xf32>
    %222 = tpu.matmul %221, %207, %cst_86 {dimension_numbers = #tpu.dot_dimension_numbers<[2], [1], [1], [2], [0, 0, 0, 1, 1, 2], [0], [0]>} : vector<4x8x8xbf16>, vector<4x8x16xbf16>, vector<4x8x16xf32> -> vector<4x8x16xf32>
    "tpu.trace_stop"() : () -> ()
    %223 = vector.shape_cast %222 : vector<4x8x16xf32> to vector<32x16xf32>
    %224 = vector.extract_strided_slice %223 {offsets = [0, 0], sizes = [16, 16], strides = [1, 1]} : vector<32x16xf32> to vector<16x16xf32>
    %225 = vector.extract_strided_slice %223 {offsets = [16, 0], sizes = [16, 16], strides = [1, 1]} : vector<32x16xf32> to vector<16x16xf32>
    %226 = tpu.concatenate %224, %225 in 1 : vector<16x16xf32>, vector<16x16xf32> -> vector<16x32xf32>
    %227 = arith.truncf %226 : vector<16x32xf32> to vector<16x32xbf16>
    %c1_87 = arith.constant 1 : index
    %c0_88 = arith.constant 0 : index
    %c0_89 = arith.constant 0 : index
    %228 = vector.load %arg8[%c1_87, %c0_88, %c0_89] : memref<4x32x32xbf16, #tpu.memory_space<vmem>>, vector<1x32x32xbf16>
    %229 = vector.shape_cast %228 : vector<1x32x32xbf16> to vector<32x32xbf16>
    %cst_90 = arith.constant dense<0.000000e+00> : vector<16x32xf32>
    %230 = tpu.matmul %227, %229, %cst_90 {dimension_numbers = #tpu.dot_dimension_numbers<[1], [0], [0], [1], [0, 0, 1, 1], [], []>} : vector<16x32xbf16>, vector<32x32xbf16>, vector<16x32xf32> -> vector<16x32xf32>
    %c1_91 = arith.constant 1 : index
    %c0_92 = arith.constant 0 : index
    %c0_93 = arith.constant 0 : index
    %231 = vector.load %arg9[%c1_91, %c0_92, %c0_93] : memref<4x1x32xf32, #tpu.memory_space<vmem>>, vector<1x1x32xf32>
    %232 = vector.shape_cast %231 : vector<1x1x32xf32> to vector<1x32xf32>
    %233 = vector.broadcast %232 : vector<1x32xf32> to vector<16x32xf32>
    %234 = arith.addf %230, %233 : vector<16x32xf32>
    %235 = arith.addf %234, %179 : vector<16x32xf32>
    %c1_94 = arith.constant 1 : index
    %c0_95 = arith.constant 0 : index
    %c0_96 = arith.constant 0 : index
    %236 = vector.load %arg10[%c1_94, %c0_95, %c0_96] : memref<4x1x32xf32, #tpu.memory_space<vmem>>, vector<1x1x32xf32>
    %237 = vector.shape_cast %236 : vector<1x1x32xf32> to vector<1x32xf32>
    %c1_97 = arith.constant 1 : index
    %c0_98 = arith.constant 0 : index
    %c0_99 = arith.constant 0 : index
    %238 = vector.load %arg11[%c1_97, %c0_98, %c0_99] : memref<4x1x32xf32, #tpu.memory_space<vmem>>, vector<1x1x32xf32>
    %239 = vector.shape_cast %238 : vector<1x1x32xf32> to vector<1x32xf32>
    %cst_100 = arith.constant dense<0.000000e+00> : vector<16xf32>
    %240 = vector.multi_reduction <add>, %235, %cst_100 [1] : vector<16x32xf32> to vector<16xf32>
    %241 = vector.shape_cast %240 : vector<16xf32> to vector<16x1xf32>
    %cst_101 = arith.constant 3.200000e+01 : f32
    %242 = vector.broadcast %cst_101 : f32 to vector<16x1xf32>
    %243 = arith.divf %241, %242 : vector<16x1xf32>
    %244 = vector.broadcast %243 : vector<16x1xf32> to vector<16x32xf32>
    %245 = arith.subf %235, %244 : vector<16x32xf32>
    %246 = arith.mulf %245, %245 : vector<16x32xf32>
    %cst_102 = arith.constant dense<0.000000e+00> : vector<16xf32>
    %247 = vector.multi_reduction <add>, %246, %cst_102 [1] : vector<16x32xf32> to vector<16xf32>
    %248 = vector.shape_cast %247 : vector<16xf32> to vector<16x1xf32>
    %cst_103 = arith.constant 3.200000e+01 : f32
    %249 = vector.broadcast %cst_103 : f32 to vector<16x1xf32>
    %250 = arith.divf %248, %249 : vector<16x1xf32>
    %251 = vector.broadcast %243 : vector<16x1xf32> to vector<16x32xf32>
    %252 = arith.subf %235, %251 : vector<16x32xf32>
    %cst_104 = arith.constant 9.99999996E-13 : f32
    %253 = vector.broadcast %cst_104 : f32 to vector<16x1xf32>
    %254 = arith.addf %250, %253 : vector<16x1xf32>
    %255 = math.rsqrt %254 : vector<16x1xf32>
    %256 = vector.broadcast %255 : vector<16x1xf32> to vector<16x32xf32>
    %257 = arith.mulf %252, %256 : vector<16x32xf32>
    %258 = vector.broadcast %237 : vector<1x32xf32> to vector<16x32xf32>
    %259 = arith.mulf %257, %258 : vector<16x32xf32>
    %260 = vector.broadcast %239 : vector<1x32xf32> to vector<16x32xf32>
    %261 = arith.addf %259, %260 : vector<16x32xf32>
    %262 = arith.truncf %261 : vector<16x32xf32> to vector<16x32xbf16>
    %c1_105 = arith.constant 1 : index
    %c0_106 = arith.constant 0 : index
    %c0_107 = arith.constant 0 : index
    %263 = vector.load %arg12[%c1_105, %c0_106, %c0_107] : memref<4x32x64xbf16, #tpu.memory_space<vmem>>, vector<1x32x64xbf16>
    %264 = vector.shape_cast %263 : vector<1x32x64xbf16> to vector<32x64xbf16>
    %cst_108 = arith.constant dense<0.000000e+00> : vector<16x64xf32>
    %265 = tpu.matmul %262, %264, %cst_108 {dimension_numbers = #tpu.dot_dimension_numbers<[1], [0], [0], [1], [0, 0, 1, 1], [], []>} : vector<16x32xbf16>, vector<32x64xbf16>, vector<16x64xf32> -> vector<16x64xf32>
    %c1_109 = arith.constant 1 : index
    %c0_110 = arith.constant 0 : index
    %c0_111 = arith.constant 0 : index
    %266 = vector.load %arg13[%c1_109, %c0_110, %c0_111] : memref<4x1x64xf32, #tpu.memory_space<vmem>>, vector<1x1x64xf32>
    %267 = vector.shape_cast %266 : vector<1x1x64xf32> to vector<1x64xf32>
    %268 = vector.broadcast %267 : vector<1x64xf32> to vector<16x64xf32>
    %269 = arith.addf %265, %268 : vector<16x64xf32>
    %270 = arith.mulf %269, %269 : vector<16x64xf32>
    %271 = arith.mulf %269, %270 : vector<16x64xf32>
    %cst_112 = arith.constant 4.471500e-02 : f32
    %272 = vector.broadcast %cst_112 : f32 to vector<16x64xf32>
    %273 = arith.mulf %272, %271 : vector<16x64xf32>
    %274 = arith.addf %269, %273 : vector<16x64xf32>
    %cst_113 = arith.constant 0.797884583 : f32
    %275 = vector.broadcast %cst_113 : f32 to vector<16x64xf32>
    %276 = arith.mulf %275, %274 : vector<16x64xf32>
    %277 = math.tanh %276 : vector<16x64xf32>
    %cst_114 = arith.constant 1.000000e+00 : f32
    %278 = vector.broadcast %cst_114 : f32 to vector<16x64xf32>
    %279 = arith.addf %278, %277 : vector<16x64xf32>
    %cst_115 = arith.constant 5.000000e-01 : f32
    %280 = vector.broadcast %cst_115 : f32 to vector<16x64xf32>
    %281 = arith.mulf %280, %279 : vector<16x64xf32>
    %282 = arith.mulf %269, %281 : vector<16x64xf32>
    %283 = arith.truncf %282 : vector<16x64xf32> to vector<16x64xbf16>
    %c1_116 = arith.constant 1 : index
    %c0_117 = arith.constant 0 : index
    %c0_118 = arith.constant 0 : index
    %284 = vector.load %arg14[%c1_116, %c0_117, %c0_118] : memref<4x64x32xbf16, #tpu.memory_space<vmem>>, vector<1x64x32xbf16>
    %285 = vector.shape_cast %284 : vector<1x64x32xbf16> to vector<64x32xbf16>
    %cst_119 = arith.constant dense<0.000000e+00> : vector<16x32xf32>
    %286 = tpu.matmul %283, %285, %cst_119 {dimension_numbers = #tpu.dot_dimension_numbers<[1], [0], [0], [1], [0, 0, 1, 1], [], []>} : vector<16x64xbf16>, vector<64x32xbf16>, vector<16x32xf32> -> vector<16x32xf32>
    %c1_120 = arith.constant 1 : index
    %c0_121 = arith.constant 0 : index
    %c0_122 = arith.constant 0 : index
    %287 = vector.load %arg15[%c1_120, %c0_121, %c0_122] : memref<4x1x32xf32, #tpu.memory_space<vmem>>, vector<1x1x32xf32>
    %288 = vector.shape_cast %287 : vector<1x1x32xf32> to vector<1x32xf32>
    %289 = vector.broadcast %288 : vector<1x32xf32> to vector<16x32xf32>
    %290 = arith.addf %286, %289 : vector<16x32xf32>
    %291 = arith.addf %290, %261 : vector<16x32xf32>
    %c1_123 = arith.constant 1 : index
    %c0_124 = arith.constant 0 : index
    %c0_125 = arith.constant 0 : index
    %292 = vector.load %arg16[%c1_123, %c0_124, %c0_125] : memref<4x1x32xf32, #tpu.memory_space<vmem>>, vector<1x1x32xf32>
    %293 = vector.shape_cast %292 : vector<1x1x32xf32> to vector<1x32xf32>
    %c1_126 = arith.constant 1 : index
    %c0_127 = arith.constant 0 : index
    %c0_128 = arith.constant 0 : index
    %294 = vector.load %arg17[%c1_126, %c0_127, %c0_128] : memref<4x1x32xf32, #tpu.memory_space<vmem>>, vector<1x1x32xf32>
    %295 = vector.shape_cast %294 : vector<1x1x32xf32> to vector<1x32xf32>
    %cst_129 = arith.constant dense<0.000000e+00> : vector<16xf32>
    %296 = vector.multi_reduction <add>, %291, %cst_129 [1] : vector<16x32xf32> to vector<16xf32>
    %297 = vector.shape_cast %296 : vector<16xf32> to vector<16x1xf32>
    %cst_130 = arith.constant 3.200000e+01 : f32
    %298 = vector.broadcast %cst_130 : f32 to vector<16x1xf32>
    %299 = arith.divf %297, %298 : vector<16x1xf32>
    %300 = vector.broadcast %299 : vector<16x1xf32> to vector<16x32xf32>
    %301 = arith.subf %291, %300 : vector<16x32xf32>
    %302 = arith.mulf %301, %301 : vector<16x32xf32>
    %cst_131 = arith.constant dense<0.000000e+00> : vector<16xf32>
    %303 = vector.multi_reduction <add>, %302, %cst_131 [1] : vector<16x32xf32> to vector<16xf32>
    %304 = vector.shape_cast %303 : vector<16xf32> to vector<16x1xf32>
    %cst_132 = arith.constant 3.200000e+01 : f32
    %305 = vector.broadcast %cst_132 : f32 to vector<16x1xf32>
    %306 = arith.divf %304, %305 : vector<16x1xf32>
    %307 = vector.broadcast %299 : vector<16x1xf32> to vector<16x32xf32>
    %308 = arith.subf %291, %307 : vector<16x32xf32>
    %cst_133 = arith.constant 9.99999996E-13 : f32
    %309 = vector.broadcast %cst_133 : f32 to vector<16x1xf32>
    %310 = arith.addf %306, %309 : vector<16x1xf32>
    %311 = math.rsqrt %310 : vector<16x1xf32>
    %312 = vector.broadcast %311 : vector<16x1xf32> to vector<16x32xf32>
    %313 = arith.mulf %308, %312 : vector<16x32xf32>
    %314 = vector.broadcast %293 : vector<1x32xf32> to vector<16x32xf32>
    %315 = arith.mulf %313, %314 : vector<16x32xf32>
    %316 = vector.broadcast %295 : vector<1x32xf32> to vector<16x32xf32>
    %317 = arith.addf %315, %316 : vector<16x32xf32>
    %318 = vector.shape_cast %317 : vector<16x32xf32> to vector<2x8x32xf32>
    %319 = vector.extract_strided_slice %318 {offsets = [0, 0, 0], sizes = [2, 1, 32], strides = [1, 1, 1]} : vector<2x8x32xf32> to vector<2x1x32xf32>
    %320 = vector.shape_cast %319 : vector<2x1x32xf32> to vector<2x32xf32>
    %321 = arith.addf %183, %320 : vector<2x32xf32>
    %322 = arith.truncf %317 : vector<16x32xf32> to vector<16x32xbf16>
    %c2 = arith.constant 2 : index
    %c0_134 = arith.constant 0 : index
    %c0_135 = arith.constant 0 : index
    %323 = vector.load %arg6[%c2, %c0_134, %c0_135] : memref<4x32x96xbf16, #tpu.memory_space<vmem>>, vector<1x32x96xbf16>
    %324 = vector.shape_cast %323 : vector<1x32x96xbf16> to vector<32x96xbf16>
    %cst_136 = arith.constant dense<0.000000e+00> : vector<16x96xf32>
    %325 = tpu.matmul %322, %324, %cst_136 {dimension_numbers = #tpu.dot_dimension_numbers<[1], [0], [0], [1], [0, 0, 1, 1], [], []>} : vector<16x32xbf16>, vector<32x96xbf16>, vector<16x96xf32> -> vector<16x96xf32>
    %c2_137 = arith.constant 2 : index
    %c0_138 = arith.constant 0 : index
    %c0_139 = arith.constant 0 : index
    %326 = vector.load %arg7[%c2_137, %c0_138, %c0_139] : memref<4x1x96xf32, #tpu.memory_space<vmem>>, vector<1x1x96xf32>
    %327 = vector.shape_cast %326 : vector<1x1x96xf32> to vector<1x96xf32>
    %328 = vector.broadcast %327 : vector<1x96xf32> to vector<16x96xf32>
    %329 = arith.addf %325, %328 : vector<16x96xf32>
    %330 = arith.truncf %329 : vector<16x96xf32> to vector<16x96xbf16>
    %331 = vector.extract_strided_slice %330 {offsets = [0, 0], sizes = [16, 32], strides = [1, 1]} : vector<16x96xbf16> to vector<16x32xbf16>
    %332 = vector.extract_strided_slice %331 {offsets = [0, 0], sizes = [16, 16], strides = [1, 1]} : vector<16x32xbf16> to vector<16x16xbf16>
    %333 = vector.extract_strided_slice %331 {offsets = [0, 16], sizes = [16, 16], strides = [1, 1]} : vector<16x32xbf16> to vector<16x16xbf16>
    %334 = tpu.concatenate %332, %333 in 0 : vector<16x16xbf16>, vector<16x16xbf16> -> vector<32x16xbf16>
    %335 = vector.shape_cast %334 : vector<32x16xbf16> to vector<4x8x16xbf16>
    %336 = vector.extract_strided_slice %330 {offsets = [0, 32], sizes = [16, 32], strides = [1, 1]} : vector<16x96xbf16> to vector<16x32xbf16>
    %337 = vector.extract_strided_slice %336 {offsets = [0, 0], sizes = [16, 16], strides = [1, 1]} : vector<16x32xbf16> to vector<16x16xbf16>
    %338 = vector.extract_strided_slice %336 {offsets = [0, 16], sizes = [16, 16], strides = [1, 1]} : vector<16x32xbf16> to vector<16x16xbf16>
    %339 = tpu.concatenate %337, %338 in 0 : vector<16x16xbf16>, vector<16x16xbf16> -> vector<32x16xbf16>
    %340 = vector.shape_cast %339 : vector<32x16xbf16> to vector<4x8x16xbf16>
    %341 = vector.extract_strided_slice %330 {offsets = [0, 64], sizes = [16, 32], strides = [1, 1]} : vector<16x96xbf16> to vector<16x32xbf16>
    %342 = vector.extract_strided_slice %341 {offsets = [0, 0], sizes = [16, 16], strides = [1, 1]} : vector<16x32xbf16> to vector<16x16xbf16>
    %343 = vector.extract_strided_slice %341 {offsets = [0, 16], sizes = [16, 16], strides = [1, 1]} : vector<16x32xbf16> to vector<16x16xbf16>
    %344 = tpu.concatenate %342, %343 in 0 : vector<16x16xbf16>, vector<16x16xbf16> -> vector<32x16xbf16>
    %345 = vector.shape_cast %344 : vector<32x16xbf16> to vector<4x8x16xbf16>
    "tpu.trace_start"() <{level = 10 : i32, message = "nqd,nkd->nqk"}> : () -> ()
    %cst_140 = arith.constant dense<0.000000e+00> : vector<4x8x8xf32>
    %346 = tpu.matmul %335, %340, %cst_140 {dimension_numbers = #tpu.dot_dimension_numbers<[2], [2], [1], [1], [0, 0, 0, 1, 1, 1], [0], [0]>} : vector<4x8x16xbf16>, vector<4x8x16xbf16>, vector<4x8x8xf32> -> vector<4x8x8xf32>
    "tpu.trace_stop"() : () -> ()
    %347 = vector.broadcast %44 : vector<4x1x8xf32> to vector<4x8x8xf32>
    %348 = arith.addf %346, %347 : vector<4x8x8xf32>
    %cst_141 = arith.constant dense<0xFF800000> : vector<4x8xf32>
    %349 = vector.multi_reduction <maximumf>, %348, %cst_141 [2] : vector<4x8x8xf32> to vector<4x8xf32>
    %350 = vector.shape_cast %349 : vector<4x8xf32> to vector<4x8x1xf32>
    %351 = vector.broadcast %350 : vector<4x8x1xf32> to vector<4x8x8xf32>
    %352 = arith.subf %348, %351 : vector<4x8x8xf32>
    %353 = math.exp %352 : vector<4x8x8xf32>
    %cst_142 = arith.constant dense<0.000000e+00> : vector<4x8xf32>
    %354 = vector.multi_reduction <add>, %353, %cst_142 [2] : vector<4x8x8xf32> to vector<4x8xf32>
    %355 = vector.shape_cast %354 : vector<4x8xf32> to vector<4x8x1xf32>
    %356 = tpu.reciprocal %355 {approx = true} : vector<4x8x1xf32> -> vector<4x8x1xf32>
    %357 = vector.broadcast %356 : vector<4x8x1xf32> to vector<4x8x8xf32>
    %358 = arith.mulf %353, %357 : vector<4x8x8xf32>
    %359 = arith.truncf %358 : vector<4x8x8xf32> to vector<4x8x8xbf16>
    "tpu.trace_start"() <{level = 10 : i32, message = "nqk,nkd->nqd"}> : () -> ()
    %cst_143 = arith.constant dense<0.000000e+00> : vector<4x8x16xf32>
    %360 = tpu.matmul %359, %345, %cst_143 {dimension_numbers = #tpu.dot_dimension_numbers<[2], [1], [1], [2], [0, 0, 0, 1, 1, 2], [0], [0]>} : vector<4x8x8xbf16>, vector<4x8x16xbf16>, vector<4x8x16xf32> -> vector<4x8x16xf32>
    "tpu.trace_stop"() : () -> ()
    %361 = vector.shape_cast %360 : vector<4x8x16xf32> to vector<32x16xf32>
    %362 = vector.extract_strided_slice %361 {offsets = [0, 0], sizes = [16, 16], strides = [1, 1]} : vector<32x16xf32> to vector<16x16xf32>
    %363 = vector.extract_strided_slice %361 {offsets = [16, 0], sizes = [16, 16], strides = [1, 1]} : vector<32x16xf32> to vector<16x16xf32>
    %364 = tpu.concatenate %362, %363 in 1 : vector<16x16xf32>, vector<16x16xf32> -> vector<16x32xf32>
    %365 = arith.truncf %364 : vector<16x32xf32> to vector<16x32xbf16>
    %c2_144 = arith.constant 2 : index
    %c0_145 = arith.constant 0 : index
    %c0_146 = arith.constant 0 : index
    %366 = vector.load %arg8[%c2_144, %c0_145, %c0_146] : memref<4x32x32xbf16, #tpu.memory_space<vmem>>, vector<1x32x32xbf16>
    %367 = vector.shape_cast %366 : vector<1x32x32xbf16> to vector<32x32xbf16>
    %cst_147 = arith.constant dense<0.000000e+00> : vector<16x32xf32>
    %368 = tpu.matmul %365, %367, %cst_147 {dimension_numbers = #tpu.dot_dimension_numbers<[1], [0], [0], [1], [0, 0, 1, 1], [], []>} : vector<16x32xbf16>, vector<32x32xbf16>, vector<16x32xf32> -> vector<16x32xf32>
    %c2_148 = arith.constant 2 : index
    %c0_149 = arith.constant 0 : index
    %c0_150 = arith.constant 0 : index
    %369 = vector.load %arg9[%c2_148, %c0_149, %c0_150] : memref<4x1x32xf32, #tpu.memory_space<vmem>>, vector<1x1x32xf32>
    %370 = vector.shape_cast %369 : vector<1x1x32xf32> to vector<1x32xf32>
    %371 = vector.broadcast %370 : vector<1x32xf32> to vector<16x32xf32>
    %372 = arith.addf %368, %371 : vector<16x32xf32>
    %373 = arith.addf %372, %317 : vector<16x32xf32>
    %c2_151 = arith.constant 2 : index
    %c0_152 = arith.constant 0 : index
    %c0_153 = arith.constant 0 : index
    %374 = vector.load %arg10[%c2_151, %c0_152, %c0_153] : memref<4x1x32xf32, #tpu.memory_space<vmem>>, vector<1x1x32xf32>
    %375 = vector.shape_cast %374 : vector<1x1x32xf32> to vector<1x32xf32>
    %c2_154 = arith.constant 2 : index
    %c0_155 = arith.constant 0 : index
    %c0_156 = arith.constant 0 : index
    %376 = vector.load %arg11[%c2_154, %c0_155, %c0_156] : memref<4x1x32xf32, #tpu.memory_space<vmem>>, vector<1x1x32xf32>
    %377 = vector.shape_cast %376 : vector<1x1x32xf32> to vector<1x32xf32>
    %cst_157 = arith.constant dense<0.000000e+00> : vector<16xf32>
    %378 = vector.multi_reduction <add>, %373, %cst_157 [1] : vector<16x32xf32> to vector<16xf32>
    %379 = vector.shape_cast %378 : vector<16xf32> to vector<16x1xf32>
    %cst_158 = arith.constant 3.200000e+01 : f32
    %380 = vector.broadcast %cst_158 : f32 to vector<16x1xf32>
    %381 = arith.divf %379, %380 : vector<16x1xf32>
    %382 = vector.broadcast %381 : vector<16x1xf32> to vector<16x32xf32>
    %383 = arith.subf %373, %382 : vector<16x32xf32>
    %384 = arith.mulf %383, %383 : vector<16x32xf32>
    %cst_159 = arith.constant dense<0.000000e+00> : vector<16xf32>
    %385 = vector.multi_reduction <add>, %384, %cst_159 [1] : vector<16x32xf32> to vector<16xf32>
    %386 = vector.shape_cast %385 : vector<16xf32> to vector<16x1xf32>
    %cst_160 = arith.constant 3.200000e+01 : f32
    %387 = vector.broadcast %cst_160 : f32 to vector<16x1xf32>
    %388 = arith.divf %386, %387 : vector<16x1xf32>
    %389 = vector.broadcast %381 : vector<16x1xf32> to vector<16x32xf32>
    %390 = arith.subf %373, %389 : vector<16x32xf32>
    %cst_161 = arith.constant 9.99999996E-13 : f32
    %391 = vector.broadcast %cst_161 : f32 to vector<16x1xf32>
    %392 = arith.addf %388, %391 : vector<16x1xf32>
    %393 = math.rsqrt %392 : vector<16x1xf32>
    %394 = vector.broadcast %393 : vector<16x1xf32> to vector<16x32xf32>
    %395 = arith.mulf %390, %394 : vector<16x32xf32>
    %396 = vector.broadcast %375 : vector<1x32xf32> to vector<16x32xf32>
    %397 = arith.mulf %395, %396 : vector<16x32xf32>
    %398 = vector.broadcast %377 : vector<1x32xf32> to vector<16x32xf32>
    %399 = arith.addf %397, %398 : vector<16x32xf32>
    %400 = arith.truncf %399 : vector<16x32xf32> to vector<16x32xbf16>
    %c2_162 = arith.constant 2 : index
    %c0_163 = arith.constant 0 : index
    %c0_164 = arith.constant 0 : index
    %401 = vector.load %arg12[%c2_162, %c0_163, %c0_164] : memref<4x32x64xbf16, #tpu.memory_space<vmem>>, vector<1x32x64xbf16>
    %402 = vector.shape_cast %401 : vector<1x32x64xbf16> to vector<32x64xbf16>
    %cst_165 = arith.constant dense<0.000000e+00> : vector<16x64xf32>
    %403 = tpu.matmul %400, %402, %cst_165 {dimension_numbers = #tpu.dot_dimension_numbers<[1], [0], [0], [1], [0, 0, 1, 1], [], []>} : vector<16x32xbf16>, vector<32x64xbf16>, vector<16x64xf32> -> vector<16x64xf32>
    %c2_166 = arith.constant 2 : index
    %c0_167 = arith.constant 0 : index
    %c0_168 = arith.constant 0 : index
    %404 = vector.load %arg13[%c2_166, %c0_167, %c0_168] : memref<4x1x64xf32, #tpu.memory_space<vmem>>, vector<1x1x64xf32>
    %405 = vector.shape_cast %404 : vector<1x1x64xf32> to vector<1x64xf32>
    %406 = vector.broadcast %405 : vector<1x64xf32> to vector<16x64xf32>
    %407 = arith.addf %403, %406 : vector<16x64xf32>
    %408 = arith.mulf %407, %407 : vector<16x64xf32>
    %409 = arith.mulf %407, %408 : vector<16x64xf32>
    %cst_169 = arith.constant 4.471500e-02 : f32
    %410 = vector.broadcast %cst_169 : f32 to vector<16x64xf32>
    %411 = arith.mulf %410, %409 : vector<16x64xf32>
    %412 = arith.addf %407, %411 : vector<16x64xf32>
    %cst_170 = arith.constant 0.797884583 : f32
    %413 = vector.broadcast %cst_170 : f32 to vector<16x64xf32>
    %414 = arith.mulf %413, %412 : vector<16x64xf32>
    %415 = math.tanh %414 : vector<16x64xf32>
    %cst_171 = arith.constant 1.000000e+00 : f32
    %416 = vector.broadcast %cst_171 : f32 to vector<16x64xf32>
    %417 = arith.addf %416, %415 : vector<16x64xf32>
    %cst_172 = arith.constant 5.000000e-01 : f32
    %418 = vector.broadcast %cst_172 : f32 to vector<16x64xf32>
    %419 = arith.mulf %418, %417 : vector<16x64xf32>
    %420 = arith.mulf %407, %419 : vector<16x64xf32>
    %421 = arith.truncf %420 : vector<16x64xf32> to vector<16x64xbf16>
    %c2_173 = arith.constant 2 : index
    %c0_174 = arith.constant 0 : index
    %c0_175 = arith.constant 0 : index
    %422 = vector.load %arg14[%c2_173, %c0_174, %c0_175] : memref<4x64x32xbf16, #tpu.memory_space<vmem>>, vector<1x64x32xbf16>
    %423 = vector.shape_cast %422 : vector<1x64x32xbf16> to vector<64x32xbf16>
    %cst_176 = arith.constant dense<0.000000e+00> : vector<16x32xf32>
    %424 = tpu.matmul %421, %423, %cst_176 {dimension_numbers = #tpu.dot_dimension_numbers<[1], [0], [0], [1], [0, 0, 1, 1], [], []>} : vector<16x64xbf16>, vector<64x32xbf16>, vector<16x32xf32> -> vector<16x32xf32>
    %c2_177 = arith.constant 2 : index
    %c0_178 = arith.constant 0 : index
    %c0_179 = arith.constant 0 : index
    %425 = vector.load %arg15[%c2_177, %c0_178, %c0_179] : memref<4x1x32xf32, #tpu.memory_space<vmem>>, vector<1x1x32xf32>
    %426 = vector.shape_cast %425 : vector<1x1x32xf32> to vector<1x32xf32>
    %427 = vector.broadcast %426 : vector<1x32xf32> to vector<16x32xf32>
    %428 = arith.addf %424, %427 : vector<16x32xf32>
    %429 = arith.addf %428, %399 : vector<16x32xf32>
    %c2_180 = arith.constant 2 : index
    %c0_181 = arith.constant 0 : index
    %c0_182 = arith.constant 0 : index
    %430 = vector.load %arg16[%c2_180, %c0_181, %c0_182] : memref<4x1x32xf32, #tpu.memory_space<vmem>>, vector<1x1x32xf32>
    %431 = vector.shape_cast %430 : vector<1x1x32xf32> to vector<1x32xf32>
    %c2_183 = arith.constant 2 : index
    %c0_184 = arith.constant 0 : index
    %c0_185 = arith.constant 0 : index
    %432 = vector.load %arg17[%c2_183, %c0_184, %c0_185] : memref<4x1x32xf32, #tpu.memory_space<vmem>>, vector<1x1x32xf32>
    %433 = vector.shape_cast %432 : vector<1x1x32xf32> to vector<1x32xf32>
    %cst_186 = arith.constant dense<0.000000e+00> : vector<16xf32>
    %434 = vector.multi_reduction <add>, %429, %cst_186 [1] : vector<16x32xf32> to vector<16xf32>
    %435 = vector.shape_cast %434 : vector<16xf32> to vector<16x1xf32>
    %cst_187 = arith.constant 3.200000e+01 : f32
    %436 = vector.broadcast %cst_187 : f32 to vector<16x1xf32>
    %437 = arith.divf %435, %436 : vector<16x1xf32>
    %438 = vector.broadcast %437 : vector<16x1xf32> to vector<16x32xf32>
    %439 = arith.subf %429, %438 : vector<16x32xf32>
    %440 = arith.mulf %439, %439 : vector<16x32xf32>
    %cst_188 = arith.constant dense<0.000000e+00> : vector<16xf32>
    %441 = vector.multi_reduction <add>, %440, %cst_188 [1] : vector<16x32xf32> to vector<16xf32>
    %442 = vector.shape_cast %441 : vector<16xf32> to vector<16x1xf32>
    %cst_189 = arith.constant 3.200000e+01 : f32
    %443 = vector.broadcast %cst_189 : f32 to vector<16x1xf32>
    %444 = arith.divf %442, %443 : vector<16x1xf32>
    %445 = vector.broadcast %437 : vector<16x1xf32> to vector<16x32xf32>
    %446 = arith.subf %429, %445 : vector<16x32xf32>
    %cst_190 = arith.constant 9.99999996E-13 : f32
    %447 = vector.broadcast %cst_190 : f32 to vector<16x1xf32>
    %448 = arith.addf %444, %447 : vector<16x1xf32>
    %449 = math.rsqrt %448 : vector<16x1xf32>
    %450 = vector.broadcast %449 : vector<16x1xf32> to vector<16x32xf32>
    %451 = arith.mulf %446, %450 : vector<16x32xf32>
    %452 = vector.broadcast %431 : vector<1x32xf32> to vector<16x32xf32>
    %453 = arith.mulf %451, %452 : vector<16x32xf32>
    %454 = vector.broadcast %433 : vector<1x32xf32> to vector<16x32xf32>
    %455 = arith.addf %453, %454 : vector<16x32xf32>
    %456 = vector.shape_cast %455 : vector<16x32xf32> to vector<2x8x32xf32>
    %457 = vector.extract_strided_slice %456 {offsets = [0, 0, 0], sizes = [2, 1, 32], strides = [1, 1, 1]} : vector<2x8x32xf32> to vector<2x1x32xf32>
    %458 = vector.shape_cast %457 : vector<2x1x32xf32> to vector<2x32xf32>
    %459 = arith.addf %321, %458 : vector<2x32xf32>
    %460 = arith.truncf %459 : vector<2x32xf32> to vector<2x32xbf16>
    %c0_191 = arith.constant 0 : index
    %c0_192 = arith.constant 0 : index
    %461 = vector.load %arg18[%c0_191, %c0_192] : memref<32x128xbf16, #tpu.memory_space<vmem>>, vector<32x128xbf16>
    %cst_193 = arith.constant dense<0.000000e+00> : vector<2x128xf32>
    %462 = tpu.matmul %460, %461, %cst_193 {dimension_numbers = #tpu.dot_dimension_numbers<[1], [0], [0], [1], [0, 0, 1, 1], [], []>} : vector<2x32xbf16>, vector<32x128xbf16>, vector<2x128xf32> -> vector<2x128xf32>
    %c0_194 = arith.constant 0 : index
    %c0_195 = arith.constant 0 : index
    %463 = vector.load %arg19[%c0_194, %c0_195] : memref<1x128xf32, #tpu.memory_space<vmem>>, vector<1x128xf32>
    %464 = vector.broadcast %463 : vector<1x128xf32> to vector<2x128xf32>
    %465 = arith.addf %462, %464 : vector<2x128xf32>
    %c0_196 = arith.constant 0 : index
    %c0_197 = arith.constant 0 : index
    %466 = vector.load %arg20[%c0_196, %c0_197] : memref<2x128xf32, #tpu.memory_space<vmem>>, vector<2x128xf32>
    tpu.vector_store %arg20[%c0_196, %c0_197], %465 {strides = array<i32>} : memref<2x128xf32, #tpu.memory_space<vmem>>, vector<2x128xf32>,
    return
  }
}

</mosaic_0001>

<bundles_post_ra>
// kernel: berrrt_forward.1
= control target key start
LH: loop header
LB: loop body
LE: loop exit
PB: predicated region body
PF: predicated region fallthrough
CT: control target
= control target key end

     0   :  { %s2975_s0 = inlined_call_operand.vmem [shape: s32[2,8], index: 0, kind: input, shape index: {}]   ;;  %s2976_s1 = inlined_call_operand.vmem [shape: s32[2,8], index: 1, kind: input, shape index: {}]   ;;  %s2977_s2 = inlined_call_operand.vmem [shape: f32[128,32], index: 2, kind: input, shape index: {}]   ;;  %s2978_s3 = inlined_call_operand.vmem [shape: f32[8,32], index: 3, kind: input, shape index: {}]   ;;  %s2979_s4 = inlined_call_operand.vmem [shape: f32[1,32], index: 4, kind: input, shape index: {}]   ;;  %s2980_s5 = inlined_call_operand.vmem [shape: f32[1,32], index: 5, kind: input, shape index: {}]   ;;  %s2981_s6 = inlined_call_operand.vmem [shape: bf16[4,32,96], index: 6, kind: input, shape index: {}]   ;;  %s2982_s7 = inlined_call_operand.vmem [shape: f32[4,1,96], index: 7, kind: input, shape index: {}]   ;;  %s2983_s8 = inlined_call_operand.vmem [shape: bf16[4,32,32], index: 8, kind: input, shape index: {}]   ;;  %s2984_s9 = inlined_call_operand.vmem [shape: f32[4,1,32], index: 9, kind: input, shape index: {}]   ;;  %s2985_s10 = inlined_call_operand.vmem [shape: f32[4,1,32], index: 10, kind: input, shape index: {}]   ;;  %s2986_s11 = inlined_call_operand.vmem [shape: f32[4,1,32], index: 11, kind: input, shape index: {}]   ;;  %s2987_s12 = inlined_call_operand.vmem [shape: bf16[4,32,64], index: 12, kind: input, shape index: {}]   ;;  %s2988_s13 = inlined_call_operand.vmem [shape: f32[4,1,64], index: 13, kind: input, shape index: {}]   ;;  %s2989_s14 = inlined_call_operand.vmem [shape: bf16[4,64,32], index: 14, kind: input, shape index: {}]   ;;  %s2990_s15 = inlined_call_operand.vmem [shape: f32[4,1,32], index: 15, kind: input, shape index: {}]   ;;  %s2991_s16 = inlined_call_operand.vmem [shape: f32[4,1,32], index: 16, kind: input, shape index: {}]   ;;  %s2992_s17 = inlined_call_operand.vmem [shape: f32[4,1,32], index: 17, kind: input, shape index: {}]   ;;  %s2993_s18 = inlined_call_operand.vmem [shape: bf16[32,128], index: 18, kind: input, shape index: {}]   ;;  %s2994_s19 = inlined_call_operand.vmem [shape: f32[1,128], index: 19, kind: input, shape index: {}]   ;;  %s2995_s20 = inlined_call_operand.hbm [shape: f32[2,128], index: 20, kind: output, shape index: {}]  }
   0x1   :  { %2997 = sst [smem:[#allocation5_spill]] %s2975_s0 }
   0x2   :  { %2998 = sst [smem:[#allocation6_spill]] %s2976_s1 }
   0x3   :  { %2999 = sst [smem:[#allocation7_spill]] %s2977_s2 }
   0x4   :  { %3000 = sst [smem:[#allocation8_spill]] %s2978_s3 }
   0x5   :  { %3001 = sst [smem:[#allocation9_spill]] %s2979_s4 }
   0x6   :  { %v69_v0 = vlaneseq  ;;  %s3002_s23 = sld [smem:[#allocation7_spill]] }
   0x7   :  { %s3003_s26 = sld [smem:[#allocation5_spill]] }
   0x8   :  { %v70_v3 = vshrl.u32 %v69_v0, 7 }
   0xa   :  { %2205 = vset.pattern.permute.xlu0 %v70_v3 }
   0xc   :  { %v105_v1 = vld [vmem:[%s3002_s23 + $0x78] sm:$0xff]  ;;  %v104_v2 = vld [vmem:[%s3002_s23 + $0x70] sm:$0xff]  ;;  %v103_v5 = vld [vmem:[%s3002_s23 + $0x68] sm:$0xff] }
   0xd   :  { %107 = vmatpush.msra.mxu0 %v105_v1  ;;  %v67_v4 = vld [vmem:[%s3003_s26] sm:$0x3]  ;;  %v101_v8 = vld [vmem:[%s3002_s23 + $0x58] sm:$0xff]  ;;  %v100_v9 = vld [vmem:[%s3002_s23 + $0x50] sm:$0xff] }
   0xe   :  { %v102_v6 = vld [vmem:[%s3002_s23 + $0x60] sm:$0xff]  ;;  %v68_v7 = vperm.slane %v67_v4, 0  ;;  %v99_v10 = vld [vmem:[%s3002_s23 + $0x48] sm:$0xff]  ;;  %v97_v12 = vld [vmem:[%s3002_s23 + $0x38] sm:$0xff] }
   0xf   :  { %108 = vmatpush.msra.mxu0 %v104_v2  ;;  %v98_v11 = vld [vmem:[%s3002_s23 + $0x40] sm:$0xff] }
  0x11   :  { %109 = vmatpush.msra.mxu0 %v103_v5 }
  0x12   :  { %73 = vperm.xlu0 %2205, %v68_v7  }
  0x13   :  { %110 = vmatpush.msra.mxu0 %v102_v6 }
  0x15   :  { %111 = vmatpush.msra.mxu0 %v101_v8 }
  0x17   :  { %112 = vmatpush.msra.mxu0 %v100_v9 }
  0x19   :  { %113 = vmatpush.msra.mxu0 %v99_v10 }
  0x1a   :  { %25 = vsyncpa [#allocation3], 0  ;;  %v75_v13 = vperm.slane %v67_v4, 1  ;;  %v96_v14 = vld [vmem:[%s3002_s23 + $0x30] sm:$0xff]  ;;  %v95_v15 = vld [vmem:[%s3002_s23 + $0x28] sm:$0xff]  ;;  %v83_v21 = vand.u32 127, %v69_v0 }
  0x1b   :  { %114 = vmatpush.msra.mxu0 %v98_v11  ;;  %v94_v16 = vld [vmem:[%s3002_s23 + $0x20] sm:$0xff]  ;;  %v93_v17 = vld [vmem:[%s3002_s23 + $0x18] sm:$0xff]  ;;  %v92_v18 = vld [vmem:[%s3002_s23 + $0x10] sm:$0xff]  ;;  %v2364_v23 = vmov 1.0   ;;  %s3004_s4 = sld [smem:[#allocation8_spill]]  ;;  %vm132_vm2 = vcmask 261120  }
  0x1c   :  { %80 = vperm.xlu0 %2205, %v75_v13   ;;  %v91_v19 = vld [vmem:[%s3002_s23 + $0x8] sm:$0xff]  ;;  %v90_v20 = vld [vmem:[%s3002_s23] sm:$0xff]  ;;  %v2365_v32 = vmov 32.0   ;;  %s3005_s22 = sld [smem:[#allocation9_spill]]  ;;  %s2367_s26 = smov 112   ;;  %vm270_vm10 = vcmask 130048  }
  0x1d   :  { %115 = vmatpush.msra.mxu0 %v97_v12  ;;  %2248 = vrcp.f32 %v2365_v32  ;;  %v2167_v49 = vld [vmem:[%s2981_s6 + $0x8] sm:$0xff]  ;;  %v2166_v51 = vld [vmem:[%s2981_s6] sm:$0xff]  ;;  %vm201_vm11 = vcmask 1041408   ;;  %vm353_vm12 = vcmask 64512   ;;  %s2368_s23 = smov 64   ;;  %vm407_vm13 = vcmask 1043456  }
  0x1e   :  { %237 = vmatpush.bf16.msra.mxu1 %v2167_v49  ;;  %v2222_v11 = vld [vmem:[%s2980_s5] ss:$0 sm:$0xff]  ;;  %s2366_s5 = smov 96   ;;  %s2369_s0 = smov 16  }
  0x1f   :  { %116 = vmatpush.msra.mxu0 %v96_v14  ;;  %s1932_s21 = sshll.u32 %s2995_s20, 4  ;;  %s1933_s21 = int_to_ptr.hbm [resolvable:$true] %s1932_s21 }
  0x21   :  { %117 = vmatpush.msra.mxu0 %v95_v15  ;;  %v106_v25 = vld [vmem:[%s3004_s4] sm:$0xff]  ;;  %s3006_s4 = sld [smem:[#allocation6_spill]] }
  0x22   :  { %238 = vmatpush.bf16.msra.mxu1 %v2166_v51  ;;  %v2221_v6 = vld [vmem:[%s3005_s22] ss:$0 sm:$0xff] }
  0x23   :  { %118 = vmatpush.msra.mxu0 %v94_v16  ;;  %v2249_v33 = vpop.eup %2248  ;;  %v2223_v16 = vld [vmem:[%s2982_s7] ss:$0 sm:$0xff] }
  0x24   :  { %v140_v34 = vmul.f32 32.0, %v2249_v33  ;;  %vm144_vm3 = vweird.f32 %v2249_v33 }
  0x25   :  { %119 = vmatpush.msra.mxu0 %v93_v17 }
  0x26   :  { %v141_v35 = vsub.f32 1.0, %v140_v34 }
  0x27   :  { %120 = vmatpush.msra.mxu0 %v92_v18 }
  0x28   :  { %v142_v36 = vmul.f32 %v2249_v33, %v141_v35 }
  0x29   :  { %121 = vmatpush.msra.mxu0 %v91_v19 }
  0x2a   :  { %v143_v37 = vadd.f32 %v2249_v33, %v142_v36 }
  0x2b   :  { %122 = vmatpush.msra.mxu0 %v90_v20 }
  0x2c   :  { %v2532_v38 = vsel %vm144_vm3, %v2249_v33, %v143_v37  ;;  %v194_v37 = vld [vmem:[%s3006_s4] sm:$0x3] }
  0x84   :  { %v74_v22 = vpop.permute.xlu0 %73 }
  0x85   :  { %vm84_vm0 = vcmp.eq.s32.totalorder %v83_v21, %v74_v22 }
  0x86   :  { %1943 = vmatmul.msk.f32.vlgmr.msra.gmra.mxu0 %vm84_vm0, %v2364_v23 }
  0x8e   :  { %v81_v24 = vpop.permute.xlu0 %80 }
  0x8f   :  { %vm85_vm1 = vcmp.eq.s32.totalorder %v83_v21, %v81_v24 }
  0x90   :  { %1944 = vmatmul.msk.f32.gmra.mxu0 %vm85_vm1, %v2364_v23 }
 0x103   :  { %v124_v26 = vpop.f32.mrf.mxu0 }
 0x104   :  { %v125_v27 = vadd.f32 %v124_v26, %v106_v25 }
 0x106   :  { %v133_v28 = vsel %vm132_vm2, %v125_v27, 0.0 }
 0x107   :  { %134 = vadd.xlane.f32.xlu1 %v133_v28 }
 0x10d   :  { %v127_v29 = vpop.f32.mrf.mxu0 }
 0x10e   :  { %v128_v30 = vadd.f32 %v127_v29, %v106_v25 }
 0x110   :  { %v136_v31 = vsel %vm132_vm2, %v128_v30, 0.0 }
 0x111   :  { %137 = vadd.xlane.f32.xlu1 %v136_v31 }
 0x17a   :  { %v135_v39 = vpop.xlane.xlu1 %134 }
 0x17b   :  { %v146_v40 = vmul.f32 %v2532_v38, %v135_v39  ;;  %v195_v39 = vcvt.s32.f32 %v194_v37 }
 0x17d   :  { %v148_v41 = vsub.f32 %v125_v27, %v146_v40  ;;  %v196_v40 = vsub.f32 1.0, %v195_v39 }
 0x17f   :  { %v150_v42 = vmul.f32 %v148_v41, %v148_v41 }
 0x181   :  { %v152_v43 = vsel %vm132_vm2, %v150_v42, 0.0 }
 0x182   :  { %153 = vadd.xlane.f32.xlu2 %v152_v43 }
 0x184   :  { %v138_v44 = vpop.xlane.xlu1 %137 }
 0x185   :  { %v147_v45 = vmul.f32 %v2532_v38, %v138_v44 }
 0x187   :  { %v149_v46 = vsub.f32 %v128_v30, %v147_v45 }
 0x189   :  { %v151_v47 = vmul.f32 %v149_v46, %v149_v46 }
 0x18b   :  { %v155_v48 = vsel %vm132_vm2, %v151_v47, 0.0 }
 0x18c   :  { %156 = vadd.xlane.f32.xlu2 %v155_v48 }
 0x1f5   :  { %v154_v50 = vpop.xlane.xlu2 %153 }
 0x1f6   :  { %v158_v52 = vmul.f32 %v154_v50, %v2532_v38 }
 0x1f8   :  { %v160_v53 = vadd.f32 1e-12, %v158_v52 }
 0x1fa   :  { %2250 = vrsqrt.f32 %v160_v53  ;;  %vm168_vm5 = vweird.f32 %v160_v53 }
 0x1ff   :  { %v157_v54 = vpop.xlane.xlu2 %156 }
 0x200   :  { %v159_v55 = vmul.f32 %v157_v54, %v2532_v38  ;;  %v2251_v56 = vpop.eup %2250 }
 0x201   :  { %v163_v58 = vmul.f32 %v2251_v56, %v160_v53  ;;  %vm169_vm4 = vweird.f32 %v2251_v56 }
 0x202   :  { %v161_v57 = vadd.f32 1e-12, %v159_v55  ;;  %vm170_vm6 = vmor %vm168_vm5, %vm169_vm4  ;;  %vm686_vm5 = vcmask 523264  }
 0x203   :  { %v164_v59 = vmul.f32 %v2251_v56, %v163_v58 }
 0x204   :  { %2252 = vrsqrt.f32 %v161_v57  ;;  %vm178_vm8 = vweird.f32 %v161_v57 }
 0x205   :  { %v165_v60 = vmul.f32 0.5, %v164_v59 }
 0x207   :  { %v166_v61 = vsub.f32 1.5, %v165_v60 }
 0x209   :  { %v167_v63 = vmul.f32 %v2251_v56, %v166_v61 }
 0x20a   :  { %v2253_v62 = vpop.eup %2252 }
 0x20b   :  { %v173_v0 = vmul.f32 %v2253_v62, %v161_v57  ;;  %v171_v2 = vsel %vm170_vm6, %v2251_v56, %v167_v63  ;;  %vm179_vm7 = vweird.f32 %v2253_v62 }
 0x20c   :  { %v182_v5 = vmul.f32 %v171_v2, %v148_v41  ;;  %vm180_vm9 = vmor %vm178_vm8, %vm179_vm7  ;;  %v197_v41 = vmul.f32 -1e+09, %v196_v40 }
 0x20d   :  { %v174_v1 = vmul.f32 %v2253_v62, %v173_v0 }
 0x20e   :  { %v187_v10 = vmul.f32 %v2221_v6, %v182_v5  ;;  %v199_v44 = vrot.slane %v197_v41, 6 }
 0x20f   :  { %v175_v3 = vmul.f32 0.5, %v174_v1 }
 0x210   :  { %v2552_v13 = vadd.f32 %v2222_v11, %v187_v10  ;;  %v202_v45 = vsel %vm201_vm11, %v197_v41, %v199_v44 }
 0x211   :  { %v176_v4 = vsub.f32 1.5, %v175_v3  ;;  %v2588_v48 = vperm.slane %v202_v45, 0  ;;  %v206_v53 = vrot.slane %v202_v45, 3  ;;  %v205_v59 = vrot.slane %v202_v45, 2 }
 0x212   :  { %v204_v3 = vrot.slane %v202_v45, 1 }
 0x213   :  { %v177_v7 = vmul.f32 %v2253_v62, %v176_v4  ;;  %v2595_v54 = vperm.slane %v206_v53, 0  ;;  %v2599_v60 = vperm.slane %v205_v59, 0 }
 0x215   :  { %v181_v8 = vsel %vm180_vm9, %v2253_v62, %v177_v7  ;;  %v2604_v7 = vperm.slane %v204_v3, 0  ;;  %v2168_v3 = vld [vmem:[%s2983_s8] sm:$0xff] }
 0x216   :  { %v183_v9 = vmul.f32 %v181_v8, %v149_v46 }
 0x218   :  { %v188_v12 = vmul.f32 %v2221_v6, %v183_v9 }
 0x21a   :  { %v2554_v14 = vadd.f32 %v2222_v11, %v188_v12 }
 0x21c   :  { %v207_v15 = vpack.c.bf16 %v2554_v14, %v2552_v13 }
 0x21e   :  { %1953 = vmatmul.msk.bf16.vlgmr.msra.gmra.mxu1 %vm132_vm2, %v207_v15 }
 0x29b   :  { %v240_v17 = vpop.f32.mrf.mxu1 }
 0x29c   :  { %v241_v18 = vadd.f32 %v2223_v16, %v240_v17 }
 0x29e   :  { %v245_v19 = vpack.c.bf16 %v241_v18, %v241_v18 }
 0x2a0   :  { %v249_v20 = vunpack.c.l.b16 %v245_v19 }
 0x2a2   :  { %v256_v21 = vpack.c.b16 %v249_v20, %v249_v20 }
 0x2a3   :  { %v242_v22 = vpop.f32.mrf.mxu1 }
 0x2a4   :  { %v243_v23 = vadd.f32 %v2223_v16, %v242_v22  ;;  %268 = vrot.lane.b32.xlu1 %v256_v21, %s2366_s5 }
 0x2a6   :  { %v246_v24 = vpack.c.bf16 %v243_v23, %v243_v23 }
 0x2a8   :  { %v250_v25 = vunpack.c.l.b16 %v246_v24 }
 0x2aa   :  { %v251_v26 = vpack.c.b16 %v250_v25, %v249_v20  ;;  %v2574_v34 = vpack.c.b16 %v250_v25, %v250_v25 }
 0x2ac   :  { %252 = vrot.lane.b32.xlu0 %v251_v26, %s2367_s26 }
 0x316   :  { %v269_v27 = vpop.permute.xlu1 %268 }
 0x317   :  { %v275_v28 = vsel %vm270_vm10, %v269_v27, 0 }
 0x318   :  { %284 = vmatpush.bf16.xpose.msra.mxu2 %v275_v28 }
 0x31e   :  { %v253_v29 = vpop.permute.xlu0 %252 }
 0x31f   :  { %v254_v30 = vunpack.c.l.b16 %v253_v29  ;;  %v255_v31 = vunpack.c.h.b16 %v253_v29  ;;  %1954 = vmatmul.msk.bf16.vlgmr.msra.gmra.mxu2 %vm270_vm10, %v256_v21 }
 0x321   :  { %v2566_v32 = vpack.c.b16 %v254_v30, %v254_v30  ;;  %v2568_v33 = vpack.c.b16 %v255_v31, %v255_v31 }
 0x323   :  { %332 = vrot.lane.b32.xlu2 %v2568_v33, %s2366_s5  ;;  %311 = vrot.lane.b32.xlu0 %v2566_v32, %s2366_s5 }
 0x32b   :  { %290 = vrot.lane.b32.xlu0 %v2574_v34, %s2366_s5 }
 0x37d   :  { %v333_v35 = vpop.permute.xlu2 %332 }
 0x37e   :  { %v338_v36 = vsel %vm270_vm10, %v333_v35, 0 }
 0x37f   :  { %347 = vmatpush.bf16.xpose.msrb.mxu2 %v338_v36 }
 0x386   :  { %1957 = vmatmul.msk.bf16.vlgmr.msrb.gmra.mxu2 %vm270_vm10, %v2568_v33 }
 0x395   :  { %v312_v42 = vpop.permute.xlu0 %311 }
 0x396   :  { %v317_v43 = vsel %vm270_vm10, %v312_v42, 0 }
 0x397   :  { %326 = vmatpush.bf16.xpose.msrb.mxu1 %v317_v43 }
 0x39d   :  { %v291_v46 = vpop.permute.xlu0 %290 }
 0x39e   :  { %1956 = vmatmul.msk.bf16.vlgmr.msrb.gmra.mxu1 %vm270_vm10, %v2566_v32  ;;  %v296_v47 = vsel %vm270_vm10, %v291_v46, 0 }
 0x39f   :  { %305 = vmatpush.bf16.xpose.msra.mxu3 %v296_v47 }
 0x3a2   :  { %v286_v49 = vpop.f32.mrf.mxu2 }
 0x3a3   :  { %v287_v50 = vadd.f32 %v286_v49, %v2588_v48 }
 0x3a5   :  { %v354_v51 = vsel %vm353_vm12, %v287_v50, -inf }
 0x3a6   :  { %355 = vmax.xlane.f32.xlu0 %v354_v51  ;;  %1955 = vmatmul.msk.bf16.vlgmr.msra.gmra.mxu3 %vm270_vm10, %v2574_v34 }
 0x3aa   :  { %v288_v52 = vpop.f32.mrf.mxu2 }
 0x3ba   :  { %402 = vrot.lane.b32.xlu0 %v256_v21, %s2368_s23 }
 0x409   :  { %v349_v55 = vpop.f32.mrf.mxu2 }
 0x40a   :  { %v350_v56 = vadd.f32 %v349_v55, %v2595_v54 }
 0x40c   :  { %v363_v57 = vsel %vm353_vm12, %v350_v56, -inf }
 0x40d   :  { %364 = vmax.xlane.f32.xlu1 %v363_v57 }
 0x411   :  { %v351_v58 = vpop.f32.mrf.mxu2 }
 0x412   :  { %v2169_v58 = vld [vmem:[%s2983_s8 + $0x8] sm:$0xff] }
 0x413   :  { %527 = vmatpush.bf16.msrb.mxu0 %v2169_v58 }
 0x417   :  { %528 = vmatpush.bf16.msrb.mxu0 %v2168_v3  ;;  %v2173_v3 = vld [vmem:[%s2989_s14 + $0x8] sm:$0xff] }
 0x419   :  { %v356_v61 = vpop.xlane.xlu0 %355 }
 0x41a   :  { %v366_v62 = vsub.f32 %v287_v50, %v356_v61 }
 0x41b   :  { %v328_v63 = vpop.f32.mrf.mxu1 }
 0x41c   :  { %v370_v0 = vmul.f32 1.442695, %v366_v62  ;;  %v329_v1 = vadd.f32 %v328_v63, %v2599_v60 }
 0x41e   :  { %2254 = vpow2.f32 %v370_v0  ;;  %v360_v2 = vsel %vm353_vm12, %v329_v1, -inf }
 0x41f   :  { %361 = vmax.xlane.f32.xlu2 %v360_v2 }
 0x423   :  { %v330_v4 = vpop.f32.mrf.mxu1 }
 0x424   :  { %v2255_v5 = vpop.eup %2254 }
 0x425   :  { %v378_v6 = vsel %vm353_vm12, %v2255_v5, 0.0 }
 0x427   :  { %379 = vadd.xlane.f32.xlu2 %v378_v6 }
 0x429   :  { %v307_v8 = vpop.f32.mrf.mxu3 }
 0x42a   :  { %v308_v9 = vadd.f32 %v307_v8, %v2604_v7 }
 0x42c   :  { %v403_v10 = vpop.permute.xlu0 %402  ;;  %v357_v11 = vsel %vm353_vm12, %v308_v9, -inf }
 0x42d   :  { %358 = vmax.xlane.f32.xlu1 %v357_v11  ;;  %v409_v12 = vsel %vm407_vm13, %v403_v10, 0  ;;  %v2224_v11 = vld [vmem:[%s2984_s9] ss:$0 sm:$0xff] }
 0x42e   :  { %418 = vmatpush.bf16.msrb.mxu3 %v409_v12 }
 0x431   :  { %v309_v15 = vpop.f32.mrf.mxu3 }
 0x480   :  { %v365_v16 = vpop.xlane.xlu1 %364 }
 0x481   :  { %v369_v17 = vsub.f32 %v350_v56, %v365_v16 }
 0x483   :  { %v376_v18 = vmul.f32 1.442695, %v369_v17 }
 0x485   :  { %2256 = vpow2.f32 %v376_v18 }
 0x48b   :  { %v2257_v19 = vpop.eup %2256 }
 0x48c   :  { %v387_v20 = vsel %vm353_vm12, %v2257_v19, 0.0 }
 0x48d   :  { %388 = vadd.xlane.f32.xlu1 %v387_v20 }
 0x492   :  { %v362_v21 = vpop.xlane.xlu2 %361 }
 0x493   :  { %v368_v22 = vsub.f32 %v329_v1, %v362_v21 }
 0x495   :  { %v374_v23 = vmul.f32 1.442695, %v368_v22 }
 0x497   :  { %2258 = vpow2.f32 %v374_v23 }
 0x49a   :  { %v380_v24 = vpop.xlane.xlu2 %379 }
 0x49b   :  { %2260 = vrcp.f32 %v380_v24 }
 0x49d   :  { %v2259_v25 = vpop.eup %2258 }
 0x49e   :  { %v384_v26 = vsel %vm353_vm12, %v2259_v25, 0.0 }
 0x49f   :  { %385 = vadd.xlane.f32.xlu2 %v384_v26 }
 0x4a0   :  { %v359_v27 = vpop.xlane.xlu1 %358 }
 0x4a1   :  { %v2261_v28 = vpop.eup %2260  ;;  %v367_v29 = vsub.f32 %v308_v9, %v359_v27 }
 0x4a2   :  { %v394_v30 = vmul.f32 %v2261_v28, %v2255_v5 }
 0x4a3   :  { %v372_v31 = vmul.f32 1.442695, %v367_v29 }
 0x4a4   :  { %v398_v35 = vpack.c.bf16 %v394_v30, %v394_v30 }
 0x4a5   :  { %2262 = vpow2.f32 %v372_v31 }
 0x4a6   :  { %466 = vrot.lane.b32.xlu1 %v2568_v33, %s2368_s23  ;;  %1958 = vmatmul.msk.bf16.vlgmr.msrb.gmra.mxu3 %vm353_vm12, %v398_v35 }
 0x4ab   :  { %v2263_v36 = vpop.eup %2262 }
 0x4ac   :  { %v381_v37 = vsel %vm353_vm12, %v2263_v36, 0.0 }
 0x4ad   :  { %382 = vadd.xlane.f32.xlu0 %v381_v37 }
 0x4b7   :  { %445 = vrot.lane.b32.xlu2 %v2566_v32, %s2368_s23 }
 0x4bf   :  { %424 = vrot.lane.b32.xlu2 %v2574_v34, %s2368_s23 }
 0x500   :  { %v389_v39 = vpop.xlane.xlu1 %388 }
 0x501   :  { %2264 = vrcp.f32 %v389_v39 }
 0x507   :  { %v2265_v41 = vpop.eup %2264 }
 0x508   :  { %v397_v42 = vmul.f32 %v2265_v41, %v2257_v19 }
 0x50a   :  { %v401_v47 = vpack.c.bf16 %v397_v42, %v397_v42 }
 0x512   :  { %v386_v40 = vpop.xlane.xlu2 %385 }
 0x513   :  { %2266 = vrcp.f32 %v386_v40 }
 0x518   :  { %v467_v43 = vpop.permute.xlu1 %466 }
 0x519   :  { %v2267_v33 = vpop.eup %2266  ;;  %v472_v44 = vsel %vm407_vm13, %v467_v43, 0 }
 0x51a   :  { %v396_v45 = vmul.f32 %v2267_v33, %v2259_v25  ;;  %v446_v46 = vpop.permute.xlu2 %445  ;;  %481 = vmatpush.bf16.msra.mxu3 %v472_v44 }
 0x51b   :  { %v451_v49 = vsel %vm407_vm13, %v446_v46, 0 }
 0x51c   :  { %v400_v32 = vpack.c.bf16 %v396_v45, %v396_v45  ;;  %460 = vmatpush.bf16.msra.mxu2 %v451_v49 }
 0x51d   :  { %1961 = vmatmul.msk.bf16.vlgmr.msra.gmra.mxu3 %vm353_vm12, %v401_v47 }
 0x51f   :  { %1960 = vmatmul.msk.bf16.vlgmr.msra.gmra.mxu2 %vm353_vm12, %v400_v32 }
 0x520   :  { %v383_v34 = vpop.xlane.xlu0 %382 }
 0x521   :  { %2268 = vrcp.f32 %v383_v34 }
 0x522   :  { %v425_v50 = vpop.permute.xlu2 %424 }
 0x523   :  { %v430_v51 = vsel %vm407_vm13, %v425_v50, 0 }
 0x524   :  { %439 = vmatpush.bf16.msra.mxu1 %v430_v51 }
 0x527   :  { %v2269_v52 = vpop.eup %2268 }
 0x528   :  { %v395_v53 = vmul.f32 %v2269_v52, %v2263_v36  ;;  %v2170_v36 = vld [vmem:[%s2987_s12] sm:$0xff] }
 0x529   :  { %v420_v55 = vpop.f32.mrf.mxu3  ;;  %v2225_v52 = vld [vmem:[%s2985_s10] ss:$0 sm:$0xff] }
 0x52a   :  { %v399_v56 = vpack.c.bf16 %v395_v53, %v395_v53 }
 0x52c   :  { %1959 = vmatmul.msk.bf16.vlgmr.msra.gmra.mxu1 %vm353_vm12, %v399_v56 }
 0x531   :  { %v422_v57 = vpop.f32.mrf.mxu3 }
 0x532   :  { %v2226_v57 = vld [vmem:[%s2986_s11] ss:$0 sm:$0xff] }
 0x5a0   :  { %v483_v59 = vpop.f32.mrf.mxu3 }
 0x5a2   :  { %v462_v61 = vpop.f32.mrf.mxu2 }
 0x5a3   :  { %v2206_v62 = vpack.i.bf16 %v483_v59, %v462_v61 }
 0x5a5   :  { %2207 = vrot.lane.b32.xlu1 %v2206_v62, %s2369_s0 }
 0x5a8   :  { %v485_v63 = vpop.f32.mrf.mxu3 }
 0x5a9   :  { %v441_v0 = vpop.f32.mrf.mxu1 }
 0x5aa   :  { %v464_v1 = vpop.f32.mrf.mxu2 }
 0x5ab   :  { %v2175_v1 = vld [vmem:[%s2989_s14 + $0x18] sm:$0xff] }
 0x5ac   :  { %694 = vmatpush.bf16.msrb.mxu2 %v2175_v1 }
 0x5b1   :  { %v443_v2 = vpop.f32.mrf.mxu1 }
 0x5b2   :  { %v2174_v2 = vld [vmem:[%s2989_s14 + $0x10] sm:$0xff] }
 0x5b3   :  { %695 = vmatpush.bf16.msrb.mxu2 %v2174_v2 }
 0x5b7   :  { %696 = vmatpush.bf16.msrb.mxu2 %v2173_v3 }
 0x617   :  { %v2208_v4 = vpop.permute.xlu1 %2207 }
 0x618   :  { %v2210_v5 = vunpack.i.h.bf16 %v2208_v4  ;;  %v2209_v6 = vunpack.i.l.bf16 %v2208_v4  ;;  %v2227_v4 = vld [vmem:[%s2988_s13] ss:$0 sm:$0xff] }
 0x61a   :  { %v495_v8 = vsel %vm270_vm10, %v420_v55, %v2209_v6  ;;  %v496_v9 = vsel %vm270_vm10, %v441_v0, %v2210_v5  ;;  %v2172_v5 = vld [vmem:[%s2989_s14] sm:$0xff] }
 0x61b   :  { %v497_v10 = vpack.c.bf16 %v496_v9, %v495_v8  ;;  %697 = vmatpush.bf16.msrb.mxu2 %v2172_v5 }
 0x61d   :  { %1970 = vmatmul.msk.bf16.vlgmr.msrb.gmra.mxu0 %vm132_vm2, %v497_v10 }
 0x69a   :  { %v530_v12 = vpop.f32.mrf.mxu0 }
 0x69b   :  { %v531_v15 = vadd.f32 %v2224_v11, %v530_v12 }
 0x69d   :  { %v535_v16 = vadd.f32 %v531_v15, %v2552_v13 }
 0x69f   :  { %v539_v17 = vsel %vm132_vm2, %v535_v16, 0.0 }
 0x6a0   :  { %540 = vadd.xlane.f32.xlu2 %v539_v17 }
 0x6a2   :  { %v532_v18 = vpop.f32.mrf.mxu0 }
 0x6a3   :  { %v533_v19 = vadd.f32 %v2224_v11, %v532_v18 }
 0x6a5   :  { %v536_v20 = vadd.f32 %v533_v19, %v2554_v14  ;;  %v2171_v14 = vld [vmem:[%s2987_s12 + $0x8] sm:$0xff] }
 0x6a6   :  { %623 = vmatpush.bf16.msrb.mxu1 %v2171_v14  ;;  %v2228_v14 = vld [vmem:[%s2990_s15] ss:$0 sm:$0xff] }
 0x6a7   :  { %v542_v21 = vsel %vm132_vm2, %v536_v20, 0.0 }
 0x6a8   :  { %543 = vadd.xlane.f32.xlu1 %v542_v21 }
 0x6aa   :  { %624 = vmatpush.bf16.msrb.mxu1 %v2170_v36 }
 0x713   :  { %v541_v22 = vpop.xlane.xlu2 %540 }
 0x714   :  { %v545_v23 = vmul.f32 %v541_v22, %v2532_v38 }
 0x716   :  { %v547_v24 = vsub.f32 %v535_v16, %v545_v23 }
 0x718   :  { %v549_v25 = vmul.f32 %v547_v24, %v547_v24 }
 0x71a   :  { %v551_v26 = vsel %vm132_vm2, %v549_v25, 0.0 }
 0x71b   :  { %v544_v27 = vpop.xlane.xlu1 %543  ;;  %552 = vadd.xlane.f32.xlu0 %v551_v26 }
 0x71c   :  { %v546_v13 = vmul.f32 %v544_v27, %v2532_v38 }
 0x71e   :  { %v548_v28 = vsub.f32 %v536_v20, %v546_v13 }
 0x720   :  { %v550_v29 = vmul.f32 %v548_v28, %v548_v28 }
 0x722   :  { %v554_v30 = vsel %vm132_vm2, %v550_v29, 0.0 }
 0x723   :  { %555 = vadd.xlane.f32.xlu0 %v554_v30 }
 0x78e   :  { %v553_v31 = vpop.xlane.xlu0 %552 }
 0x78f   :  { %v557_v35 = vmul.f32 %v553_v31, %v2532_v38 }
 0x791   :  { %v559_v37 = vadd.f32 1e-12, %v557_v35 }
 0x793   :  { %2270 = vrsqrt.f32 %v559_v37  ;;  %vm567_vm15 = vweird.f32 %v559_v37 }
 0x796   :  { %v556_v39 = vpop.xlane.xlu0 %555 }
 0x797   :  { %v558_v40 = vmul.f32 %v556_v39, %v2532_v38 }
 0x799   :  { %v2271_v41 = vpop.eup %2270  ;;  %v560_v42 = vadd.f32 1e-12, %v558_v40 }
 0x79a   :  { %v562_v43 = vmul.f32 %v2271_v41, %v559_v37  ;;  %vm568_vm14 = vweird.f32 %v2271_v41 }
 0x79b   :  { %2272 = vrsqrt.f32 %v560_v42  ;;  %vm569_vm0 = vmor %vm567_vm15, %vm568_vm14  ;;  %vm577_vm3 = vweird.f32 %v560_v42 }
 0x79c   :  { %v563_v33 = vmul.f32 %v2271_v41, %v562_v43 }
 0x79e   :  { %v564_v44 = vmul.f32 0.5, %v563_v33 }
 0x7a0   :  { %v565_v45 = vsub.f32 1.5, %v564_v44 }
 0x7a1   :  { %v2273_v46 = vpop.eup %2272 }
 0x7a2   :  { %v566_v47 = vmul.f32 %v2271_v41, %v565_v45  ;;  %v572_v49 = vmul.f32 %v2273_v46, %v560_v42  ;;  %vm578_vm1 = vweird.f32 %v2273_v46 }
 0x7a3   :  { %vm579_vm4 = vmor %vm577_vm3, %vm578_vm1 }
 0x7a4   :  { %v573_v32 = vmul.f32 %v2273_v46, %v572_v49  ;;  %v570_v34 = vsel %vm569_vm0, %v2271_v41, %v566_v47 }
 0x7a5   :  { %v581_v53 = vmul.f32 %v570_v34, %v547_v24 }
 0x7a6   :  { %v574_v50 = vmul.f32 0.5, %v573_v32 }
 0x7a7   :  { %v586_v58 = vmul.f32 %v2225_v52, %v581_v53 }
 0x7a8   :  { %v575_v51 = vsub.f32 1.5, %v574_v50 }
 0x7a9   :  { %v591_v62 = vadd.f32 %v2226_v57, %v586_v58 }
 0x7aa   :  { %v576_v55 = vmul.f32 %v2273_v46, %v575_v51  ;;  %v2177_v51 = vld [vmem:[%s2981_s6 + $0x18] sm:$0xff] }
 0x7ab   :  { %796 = vmatpush.bf16.msrb.mxu3 %v2177_v51 }
 0x7ac   :  { %v580_v56 = vsel %vm579_vm4, %v2273_v46, %v576_v55  ;;  %v2176_v55 = vld [vmem:[%s2981_s6 + $0x10] sm:$0xff] }
 0x7ad   :  { %v582_v59 = vmul.f32 %v580_v56, %v548_v28 }
 0x7af   :  { %v587_v61 = vmul.f32 %v2225_v52, %v582_v59  ;;  %797 = vmatpush.bf16.msrb.mxu3 %v2176_v55 }
 0x7b1   :  { %v592_v63 = vadd.f32 %v2226_v57, %v587_v61 }
 0x7b3   :  { %v593_v0 = vpack.c.bf16 %v592_v63, %v591_v62 }
 0x7b5   :  { %1979 = vmatmul.msk.bf16.vlgmr.msrb.gmra.mxu1 %vm132_vm2, %v593_v0 }
 0x832   :  { %v626_v6 = vpop.f32.mrf.mxu1 }
 0x833   :  { %v627_v8 = vadd.f32 %v2227_v4, %v626_v6 }
 0x835   :  { %v631_v9 = vmul.f32 %v627_v8, %v627_v8 }
 0x837   :  { %v633_v10 = vmul.f32 %v631_v9, %v627_v8 }
 0x839   :  { %v635_v11 = vmul.f32 0.044715, %v633_v10  ;;  %v2229_v10 = vld [vmem:[%s2991_s16] ss:$0 sm:$0xff] }
 0x83a   :  { %v628_v12 = vpop.f32.mrf.mxu1 }
 0x83b   :  { %v637_v15 = vadd.f32 %v635_v11, %v627_v8  ;;  %v629_v16 = vadd.f32 %v2227_v4, %v628_v12 }
 0x83d   :  { %v639_v17 = vmul.f32 0.7978846, %v637_v15  ;;  %v632_v18 = vmul.f32 %v629_v16, %v629_v16 }
 0x83f   :  { %v634_v19 = vmul.f32 %v632_v18, %v629_v16  ;;  %2274 = vtanh.f32 %v639_v17 }
 0x841   :  { %v636_v20 = vmul.f32 0.044715, %v634_v19 }
 0x843   :  { %v638_v21 = vadd.f32 %v636_v20, %v629_v16 }
 0x845   :  { %v640_v22 = vmul.f32 0.7978846, %v638_v21  ;;  %v2275_v23 = vpop.eup %2274 }
 0x846   :  { %v643_v24 = vadd.f32 1.0, %v2275_v23 }
 0x847   :  { %2276 = vtanh.f32 %v640_v22 }
 0x848   :  { %v645_v26 = vmul.f32 0.5, %v643_v24  ;;  %v2231_v24 = vld [vmem:[%s2982_s7 + $0x1] ss:$0 sm:$0xff] }
 0x84a   :  { %v647_v28 = vmul.f32 %v645_v26, %v627_v8 }
 0x84d   :  { %v2277_v25 = vpop.eup %2276 }
 0x84e   :  { %v644_v27 = vadd.f32 1.0, %v2277_v25 }
 0x850   :  { %v646_v13 = vmul.f32 0.5, %v644_v27 }
 0x852   :  { %v648_v29 = vmul.f32 %v646_v13, %v629_v16  ;;  %v2230_v16 = vld [vmem:[%s2992_s17] ss:$0 sm:$0xff] }
 0x854   :  { %v649_v30 = vpack.c.bf16 %v648_v29, %v647_v28 }
 0x856   :  { %1996 = vmatmul.msk.bf16.vlgmr.msrb.gmra.mxu2 %vm686_vm5, %v649_v30 }
 0x8d9   :  { %v699_v31 = vpop.f32.mrf.mxu2 }
 0x8da   :  { %v700_v35 = vadd.f32 %v2228_v14, %v699_v31 }
 0x8dc   :  { %v704_v36 = vadd.f32 %v700_v35, %v591_v62 }
 0x8de   :  { %v708_v37 = vsel %vm132_vm2, %v704_v36, 0.0 }
 0x8df   :  { %709 = vadd.xlane.f32.xlu0 %v708_v37 }
 0x8e1   :  { %v701_v39 = vpop.f32.mrf.mxu2 }
 0x8e2   :  { %v702_v40 = vadd.f32 %v2228_v14, %v701_v39 }
 0x8e4   :  { %v705_v41 = vadd.f32 %v702_v40, %v592_v63 }
 0x8e6   :  { %v711_v42 = vsel %vm132_vm2, %v705_v41, 0.0 }
 0x8e7   :  { %712 = vadd.xlane.f32.xlu0 %v711_v42 }
 0x952   :  { %v710_v43 = vpop.xlane.xlu0 %709 }
 0x953   :  { %v714_v33 = vmul.f32 %v710_v43, %v2532_v38 }
 0x955   :  { %v716_v44 = vsub.f32 %v704_v36, %v714_v33 }
 0x957   :  { %v718_v45 = vmul.f32 %v716_v44, %v716_v44 }
 0x959   :  { %v720_v46 = vsel %vm132_vm2, %v718_v45, 0.0 }
 0x95a   :  { %721 = vadd.xlane.f32.xlu2 %v720_v46  ;;  %v713_v47 = vpop.xlane.xlu0 %712 }
 0x95b   :  { %v715_v49 = vmul.f32 %v713_v47, %v2532_v38 }
 0x95d   :  { %v717_v32 = vsub.f32 %v705_v41, %v715_v49 }
 0x95f   :  { %v719_v34 = vmul.f32 %v717_v32, %v717_v32 }
 0x961   :  { %v723_v50 = vsel %vm132_vm2, %v719_v34, 0.0 }
 0x962   :  { %724 = vadd.xlane.f32.xlu1 %v723_v50 }
 0x9cd   :  { %v722_v52 = vpop.xlane.xlu2 %721 }
 0x9ce   :  { %v726_v53 = vmul.f32 %v722_v52, %v2532_v38 }
 0x9d0   :  { %v728_v56 = vadd.f32 1e-12, %v726_v53 }
 0x9d2   :  { %2278 = vrsqrt.f32 %v728_v56  ;;  %vm736_vm7 = vweird.f32 %v728_v56 }
 0x9d5   :  { %v725_v57 = vpop.xlane.xlu1 %724 }
 0x9d6   :  { %v727_v58 = vmul.f32 %v725_v57, %v2532_v38 }
 0x9d8   :  { %v2279_v59 = vpop.eup %2278  ;;  %v729_v61 = vadd.f32 1e-12, %v727_v58 }
 0x9d9   :  { %v731_v62 = vmul.f32 %v2279_v59, %v728_v56  ;;  %vm737_vm6 = vweird.f32 %v2279_v59 }
 0x9da   :  { %2280 = vrsqrt.f32 %v729_v61  ;;  %vm738_vm8 = vmor %vm736_vm7, %vm737_vm6  ;;  %vm746_vm11 = vweird.f32 %v729_v61 }
 0x9db   :  { %v732_v63 = vmul.f32 %v2279_v59, %v731_v62 }
 0x9dd   :  { %v733_v0 = vmul.f32 0.5, %v732_v63 }
 0x9df   :  { %v734_v1 = vsub.f32 1.5, %v733_v0 }
 0x9e0   :  { %v2281_v2 = vpop.eup %2280 }
 0x9e1   :  { %v735_v3 = vmul.f32 %v2279_v59, %v734_v1  ;;  %v741_v4 = vmul.f32 %v2281_v2, %v729_v61  ;;  %vm747_vm9 = vweird.f32 %v2281_v2 }
 0x9e2   :  { %vm748_vm14 = vmor %vm746_vm11, %vm747_vm9 }
 0x9e3   :  { %v742_v5 = vmul.f32 %v2281_v2, %v741_v4  ;;  %v739_v6 = vsel %vm738_vm8, %v2279_v59, %v735_v3 }
 0x9e4   :  { %v750_v11 = vmul.f32 %v739_v6, %v716_v44 }
 0x9e5   :  { %v743_v8 = vmul.f32 0.5, %v742_v5 }
 0x9e6   :  { %v755_v17 = vmul.f32 %v2229_v10, %v750_v11 }
 0x9e7   :  { %v744_v9 = vsub.f32 1.5, %v743_v8 }
 0x9e8   :  { %v2700_v20 = vadd.f32 %v2230_v16, %v755_v17 }
 0x9e9   :  { %v745_v12 = vmul.f32 %v2281_v2, %v744_v9 }
 0x9eb   :  { %v749_v15 = vsel %vm748_vm14, %v2281_v2, %v745_v12 }
 0x9ec   :  { %v751_v18 = vmul.f32 %v749_v15, %v717_v32 }
 0x9ee   :  { %v756_v19 = vmul.f32 %v2229_v10, %v751_v18 }
 0x9f0   :  { %v2702_v21 = vadd.f32 %v2230_v16, %v756_v19 }
 0x9f2   :  { %v764_v22 = vpack.c.bf16 %v2702_v21, %v2700_v20 }
 0x9f4   :  { %2010 = vmatmul.msk.bf16.vlgmr.msrb.gmra.mxu3 %vm132_vm2, %v764_v22 }
 0xa77   :  { %v799_v23 = vpop.f32.mrf.mxu3 }
 0xa78   :  { %v800_v25 = vadd.f32 %v2231_v24, %v799_v23 }
 0xa7a   :  { %v804_v27 = vpack.c.bf16 %v800_v25, %v800_v25 }
 0xa7c   :  { %v808_v29 = vunpack.c.l.b16 %v804_v27 }
 0xa7e   :  { %v815_v31 = vpack.c.b16 %v808_v29, %v808_v29 }
 0xa7f   :  { %v801_v26 = vpop.f32.mrf.mxu3 }
 0xa80   :  { %v802_v13 = vadd.f32 %v2231_v24, %v801_v26 }
 0xa82   :  { %v805_v28 = vpack.c.bf16 %v802_v13, %v802_v13 }
 0xa84   :  { %v809_v30 = vunpack.c.l.b16 %v805_v28 }
 0xa86   :  { %v810_v14 = vpack.c.b16 %v809_v30, %v808_v29  ;;  %v2718_v43 = vpack.c.b16 %v809_v30, %v809_v30 }
 0xa88   :  { %811 = vrot.lane.b32.xlu0 %v810_v14, %s2367_s26 }
 0xa90   :  { %819 = vrot.lane.b32.xlu0 %v815_v31, %s2366_s5 }
 0xafa   :  { %v812_v35 = vpop.permute.xlu0 %811 }
 0xafb   :  { %v813_v36 = vunpack.c.l.b16 %v812_v35  ;;  %v814_v37 = vunpack.c.h.b16 %v812_v35 }
 0xafd   :  { %v817_v39 = vpack.c.b16 %v813_v36, %v813_v36  ;;  %v2712_v40 = vpack.c.b16 %v814_v37, %v814_v37 }
 0xaff   :  { %882 = vrot.lane.b32.xlu1 %v2712_v40, %s2366_s5  ;;  %861 = vrot.lane.b32.xlu2 %v817_v39, %s2366_s5 }
 0xb02   :  { %v820_v41 = vpop.permute.xlu0 %819 }
 0xb03   :  { %v825_v42 = vsel %vm270_vm10, %v820_v41, 0 }
 0xb04   :  { %834 = vmatpush.bf16.xpose.msra.mxu0 %v825_v42 }
 0xb07   :  { %840 = vrot.lane.b32.xlu2 %v2718_v43, %s2366_s5 }
 0xb0b   :  { %2011 = vmatmul.msk.bf16.vlgmr.msra.gmra.mxu0 %vm270_vm10, %v815_v31 }
 0xb59   :  { %v862_v33 = vpop.permute.xlu2 %861 }
 0xb5a   :  { %v867_v44 = vsel %vm270_vm10, %v862_v33, 0 }
 0xb5b   :  { %876 = vmatpush.bf16.xpose.msra.mxu2 %v867_v44 }
 0xb61   :  { %v841_v45 = vpop.permute.xlu2 %840 }
 0xb62   :  { %v846_v46 = vsel %vm270_vm10, %v841_v45, 0  ;;  %2013 = vmatmul.msk.bf16.vlgmr.msra.gmra.mxu2 %vm270_vm10, %v817_v39 }
 0xb63   :  { %855 = vmatpush.bf16.xpose.msra.mxu1 %v846_v46 }
 0xb6a   :  { %2012 = vmatmul.msk.bf16.vlgmr.msra.gmra.mxu1 %vm270_vm10, %v2718_v43 }
 0xb71   :  { %v883_v47 = vpop.permute.xlu1 %882 }
 0xb72   :  { %v888_v49 = vsel %vm270_vm10, %v883_v47, 0 }
 0xb73   :  { %897 = vmatpush.bf16.xpose.msra.mxu3 %v888_v49 }
 0xb7a   :  { %2014 = vmatmul.msk.bf16.vlgmr.msra.gmra.mxu3 %vm270_vm10, %v2712_v40 }
 0xb88   :  { %v836_v32 = vpop.f32.mrf.mxu0 }
 0xb89   :  { %v837_v34 = vadd.f32 %v836_v32, %v2588_v48 }
 0xb8b   :  { %v903_v50 = vsel %vm353_vm12, %v837_v34, -inf }
 0xb8c   :  { %904 = vmax.xlane.f32.xlu2 %v903_v50 }
 0xb90   :  { %v838_v51 = vpop.f32.mrf.mxu0 }
 0xbe5   :  { %v878_v52 = vpop.f32.mrf.mxu2 }
 0xbe6   :  { %v879_v53 = vadd.f32 %v878_v52, %v2599_v60 }
 0xbe7   :  { %v857_v55 = vpop.f32.mrf.mxu1 }
 0xbe8   :  { %v909_v56 = vsel %vm353_vm12, %v879_v53, -inf  ;;  %v858_v57 = vadd.f32 %v857_v55, %v2604_v7 }
 0xbe9   :  { %910 = vmax.xlane.f32.xlu0 %v909_v56 }
 0xbea   :  { %v906_v61 = vsel %vm353_vm12, %v858_v57, -inf }
 0xbed   :  { %v880_v58 = vpop.f32.mrf.mxu2 }
 0xbef   :  { %v859_v59 = vpop.f32.mrf.mxu1 }
 0xbf1   :  { %907 = vmax.xlane.f32.xlu0 %v906_v61 }
 0xbfd   :  { %v899_v62 = vpop.f32.mrf.mxu3 }
 0xbfe   :  { %v900_v63 = vadd.f32 %v899_v62, %v2595_v54 }
 0xbff   :  { %v905_v9 = vpop.xlane.xlu2 %904 }
 0xc00   :  { %v912_v0 = vsel %vm353_vm12, %v900_v63, -inf  ;;  %v915_v12 = vsub.f32 %v837_v34, %v905_v9 }
 0xc01   :  { %913 = vmax.xlane.f32.xlu1 %v912_v0 }
 0xc02   :  { %v919_v18 = vmul.f32 1.442695, %v915_v12 }
 0xc05   :  { %v901_v1 = vpop.f32.mrf.mxu3  ;;  %993 = vrot.lane.b32.xlu0 %v817_v39, %s2368_s23 }
 0xc0d   :  { %951 = vrot.lane.b32.xlu0 %v815_v31, %s2368_s23 }
 0xc5c   :  { %v911_v2 = vpop.xlane.xlu0 %910 }
 0xc5d   :  { %v917_v3 = vsub.f32 %v879_v53, %v911_v2  ;;  %v2179_v53 = vld [vmem:[%s2983_s8 + $0x18] sm:$0xff] }
 0xc5f   :  { %v923_v4 = vmul.f32 1.442695, %v917_v3 }
 0xc61   :  { %2282 = vpow2.f32 %v923_v4 }
 0xc64   :  { %v908_v8 = vpop.xlane.xlu0 %907 }
 0xc65   :  { %v916_v22 = vsub.f32 %v858_v57, %v908_v8 }
 0xc67   :  { %v2283_v5 = vpop.eup %2282  ;;  %v921_v26 = vmul.f32 1.442695, %v916_v22 }
 0xc68   :  { %v933_v6 = vsel %vm353_vm12, %v2283_v5, 0.0 }
 0xc69   :  { %934 = vadd.xlane.f32.xlu1 %v933_v6  ;;  %v2232_v6 = vld [vmem:[%s2984_s9 + $0x1] ss:$0 sm:$0xff] }
 0xc74   :  { %v914_v10 = vpop.xlane.xlu1 %913 }
 0xc75   :  { %v918_v11 = vsub.f32 %v900_v63, %v914_v10  ;;  %v2178_v63 = vld [vmem:[%s2983_s8 + $0x10] sm:$0xff] }
 0xc77   :  { %v925_v15 = vmul.f32 1.442695, %v918_v11  ;;  %v994_v16 = vpop.permute.xlu0 %993 }
 0xc78   :  { %v999_v17 = vsel %vm407_vm13, %v994_v16, 0 }
 0xc79   :  { %2284 = vpow2.f32 %v925_v15  ;;  %1008 = vmatpush.bf16.msrb.mxu2 %v999_v17 }
 0xc7a   :  { %2286 = vpow2.f32 %v919_v18 }
 0xc7b   :  { %2288 = vpow2.f32 %v921_v26 }
 0xc7f   :  { %v2285_v19 = vpop.eup %2284  ;;  %v952_v23 = vpop.permute.xlu0 %951 }
 0xc80   :  { %v957_v24 = vsel %vm407_vm13, %v952_v23, 0  ;;  %v936_v25 = vsel %vm353_vm12, %v2285_v19, 0.0  ;;  %v2287_v27 = vpop.eup %2286 }
 0xc81   :  { %937 = vadd.xlane.f32.xlu2 %v936_v25  ;;  %966 = vmatpush.bf16.msrb.mxu0 %v957_v24  ;;  %v927_v13 = vsel %vm353_vm12, %v2287_v27, 0.0  ;;  %v2289_v28 = vpop.eup %2288 }
 0xc82   :  { %1014 = vrot.lane.b32.xlu1 %v2712_v40, %s2368_s23  ;;  %v930_v29 = vsel %vm353_vm12, %v2289_v28, 0.0 }
 0xc85   :  { %1077 = vmatpush.bf16.msra.mxu0 %v2179_v53 }
 0xc89   :  { %928 = vadd.xlane.f32.xlu2 %v927_v13  ;;  %1078 = vmatpush.bf16.msra.mxu0 %v2178_v63  ;;  %v2185_v63 = vld [vmem:[%s2989_s14 + $0x38] sm:$0xff] }
 0xc8a   :  { %1249 = vmatpush.bf16.msra.mxu2 %v2185_v63 }
 0xc91   :  { %931 = vadd.xlane.f32.xlu2 %v930_v29  ;;  %v2181_v29 = vld [vmem:[%s2987_s12 + $0x18] sm:$0xff] }
 0xca9   :  { %972 = vrot.lane.b32.xlu2 %v2718_v43, %s2368_s23 }
 0xcdc   :  { %v935_v30 = vpop.xlane.xlu1 %934 }
 0xcdd   :  { %2290 = vrcp.f32 %v935_v30 }
 0xce3   :  { %v2291_v14 = vpop.eup %2290 }
 0xce4   :  { %v945_v31 = vmul.f32 %v2291_v14, %v2283_v5 }
 0xce6   :  { %v949_v35 = vpack.c.bf16 %v945_v31, %v945_v31  ;;  %v2180_v31 = vld [vmem:[%s2987_s12 + $0x10] sm:$0xff] }
 0xce8   :  { %2017 = vmatmul.msk.bf16.vlgmr.msrb.gmra.mxu2 %vm353_vm12, %v949_v35 }
 0xcf4   :  { %v938_v36 = vpop.xlane.xlu2 %937  ;;  %v1015_v37 = vpop.permute.xlu1 %1014 }
 0xcf5   :  { %2292 = vrcp.f32 %v938_v36  ;;  %v1020_v39 = vsel %vm407_vm13, %v1015_v37, 0 }
 0xcf6   :  { %1029 = vmatpush.bf16.msrb.mxu3 %v1020_v39 }
 0xcfb   :  { %v2293_v40 = vpop.eup %2292 }
 0xcfc   :  { %v946_v41 = vmul.f32 %v2293_v40, %v2285_v19  ;;  %v929_v42 = vpop.xlane.xlu2 %928 }
 0xcfd   :  { %2294 = vrcp.f32 %v929_v42 }
 0xcfe   :  { %v950_v33 = vpack.c.bf16 %v946_v41, %v946_v41 }
 0xd00   :  { %2018 = vmatmul.msk.bf16.vlgmr.msrb.gmra.mxu3 %vm353_vm12, %v950_v33 }
 0xd03   :  { %v2295_v43 = vpop.eup %2294 }
 0xd04   :  { %v943_v44 = vmul.f32 %v2295_v43, %v2287_v27  ;;  %v932_v45 = vpop.xlane.xlu2 %931 }
 0xd05   :  { %2296 = vrcp.f32 %v932_v45 }
 0xd06   :  { %v947_v46 = vpack.c.bf16 %v943_v44, %v943_v44 }
 0xd08   :  { %2015 = vmatmul.msk.bf16.vlgmr.msrb.gmra.mxu0 %vm353_vm12, %v947_v46 }
 0xd0b   :  { %v2297_v47 = vpop.eup %2296 }
 0xd0c   :  { %v944_v49 = vmul.f32 %v2297_v47, %v2289_v28  ;;  %v973_v32 = vpop.permute.xlu2 %972 }
 0xd0d   :  { %v978_v34 = vsel %vm407_vm13, %v973_v32, 0 }
 0xd0e   :  { %v948_v50 = vpack.c.bf16 %v944_v49, %v944_v49  ;;  %987 = vmatpush.bf16.msrb.mxu1 %v978_v34 }
 0xd11   :  { %2016 = vmatmul.msk.bf16.vlgmr.msrb.gmra.mxu1 %vm353_vm12, %v948_v50  ;;  %v2233_v50 = vld [vmem:[%s2985_s10 + $0x1] ss:$0 sm:$0xff] }
 0xd12   :  { %1177 = vmatpush.bf16.msra.mxu1 %v2181_v29 }
 0xd16   :  { %1178 = vmatpush.bf16.msra.mxu1 %v2180_v31 }
 0xd6b   :  { %v1010_v51 = vpop.f32.mrf.mxu2 }
 0xd73   :  { %v1012_v52 = vpop.f32.mrf.mxu2 }
 0xd83   :  { %v1031_v55 = vpop.f32.mrf.mxu3 }
 0xd84   :  { %v2211_v56 = vpack.i.bf16 %v1031_v55, %v1010_v51  ;;  %v2234_v55 = vld [vmem:[%s2986_s11 + $0x1] ss:$0 sm:$0xff] }
 0xd85   :  { %v968_v57 = vpop.f32.mrf.mxu0 }
 0xd86   :  { %2212 = vrot.lane.b32.xlu0 %v2211_v56, %s2369_s0 }
 0xd8b   :  { %v1033_v58 = vpop.f32.mrf.mxu3 }
 0xd8d   :  { %v970_v59 = vpop.f32.mrf.mxu0 }
 0xd8e   :  { %v989_v61 = vpop.f32.mrf.mxu1 }
 0xd96   :  { %v991_v62 = vpop.f32.mrf.mxu1 }
 0xdf8   :  { %v2213_v0 = vpop.permute.xlu0 %2212 }
 0xdf9   :  { %v2215_v1 = vunpack.i.h.bf16 %v2213_v0  ;;  %v2214_v2 = vunpack.i.l.bf16 %v2213_v0  ;;  %v2184_v0 = vld [vmem:[%s2989_s14 + $0x30] sm:$0xff] }
 0xdfa   :  { %1250 = vmatpush.bf16.msra.mxu2 %v2184_v0 }
 0xdfb   :  { %v1044_v3 = vsel %vm270_vm10, %v989_v61, %v2215_v1  ;;  %v1043_v4 = vsel %vm270_vm10, %v968_v57, %v2214_v2  ;;  %v2183_v1 = vld [vmem:[%s2989_s14 + $0x28] sm:$0xff]  ;;  %v2235_v2 = vld [vmem:[%s2988_s13 + $0x1] ss:$0 sm:$0xff] }
 0xdfc   :  { %v1045_v5 = vpack.c.bf16 %v1044_v3, %v1043_v4  ;;  %v2182_v3 = vld [vmem:[%s2989_s14 + $0x20] sm:$0xff] }
 0xdfe   :  { %2032 = vmatmul.msk.bf16.vlgmr.msra.gmra.mxu0 %vm132_vm2, %v1045_v5  ;;  %1251 = vmatpush.bf16.msra.mxu2 %v2183_v1 }
 0xe02   :  { %1252 = vmatpush.bf16.msra.mxu2 %v2182_v3 }
 0xe7b   :  { %v1080_v8 = vpop.f32.mrf.mxu0 }
 0xe7c   :  { %v1081_v9 = vadd.f32 %v2232_v6, %v1080_v8 }
 0xe7e   :  { %v1085_v10 = vadd.f32 %v1081_v9, %v2700_v20 }
 0xe80   :  { %v1091_v11 = vsel %vm132_vm2, %v1085_v10, 0.0 }
 0xe81   :  { %1092 = vadd.xlane.f32.xlu1 %v1091_v11 }
 0xe83   :  { %v1082_v12 = vpop.f32.mrf.mxu0 }
 0xe84   :  { %v1083_v15 = vadd.f32 %v2232_v6, %v1082_v12 }
 0xe86   :  { %v1086_v16 = vadd.f32 %v1083_v15, %v2702_v21 }
 0xe88   :  { %v1094_v17 = vsel %vm132_vm2, %v1086_v16, 0.0 }
 0xe89   :  { %1095 = vadd.xlane.f32.xlu0 %v1094_v17 }
 0xef4   :  { %v1093_v18 = vpop.xlane.xlu1 %1092 }
 0xef5   :  { %v1097_v19 = vmul.f32 %v1093_v18, %v2532_v38 }
 0xef7   :  { %v1099_v22 = vsub.f32 %v1085_v10, %v1097_v19 }
 0xef9   :  { %v1101_v23 = vmul.f32 %v1099_v22, %v1099_v22 }
 0xefb   :  { %v1103_v24 = vsel %vm132_vm2, %v1101_v23, 0.0 }
 0xefc   :  { %v1096_v25 = vpop.xlane.xlu0 %1095  ;;  %1104 = vadd.xlane.f32.xlu2 %v1103_v24 }
 0xefd   :  { %v1098_v26 = vmul.f32 %v1096_v25, %v2532_v38 }
 0xeff   :  { %v1100_v27 = vsub.f32 %v1086_v16, %v1098_v26 }
 0xf01   :  { %v1102_v13 = vmul.f32 %v1100_v27, %v1100_v27 }
 0xf03   :  { %v1106_v28 = vsel %vm132_vm2, %v1102_v13, 0.0 }
 0xf04   :  { %1107 = vadd.xlane.f32.xlu1 %v1106_v28 }
 0xf6f   :  { %v1105_v30 = vpop.xlane.xlu2 %1104 }
 0xf70   :  { %v1109_v14 = vmul.f32 %v1105_v30, %v2532_v38 }
 0xf72   :  { %v1111_v35 = vadd.f32 1e-12, %v1109_v14  ;;  %v2236_v14 = vld [vmem:[%s2990_s15 + $0x1] ss:$0 sm:$0xff] }
 0xf74   :  { %2298 = vrsqrt.f32 %v1111_v35  ;;  %vm1119_vm0 = vweird.f32 %v1111_v35 }
 0xf77   :  { %v1108_v36 = vpop.xlane.xlu1 %1107 }
 0xf78   :  { %v1110_v37 = vmul.f32 %v1108_v36, %v2532_v38 }
 0xf7a   :  { %v2299_v39 = vpop.eup %2298  ;;  %v1112_v40 = vadd.f32 1e-12, %v1110_v37 }
 0xf7b   :  { %v1114_v41 = vmul.f32 %v2299_v39, %v1111_v35  ;;  %vm1120_vm15 = vweird.f32 %v2299_v39 }
 0xf7c   :  { %2300 = vrsqrt.f32 %v1112_v40  ;;  %vm1121_vm1 = vmor %vm1119_vm0, %vm1120_vm15  ;;  %vm1129_vm4 = vweird.f32 %v1112_v40 }
 0xf7d   :  { %v1115_v42 = vmul.f32 %v2299_v39, %v1114_v41 }
 0xf7f   :  { %v1116_v33 = vmul.f32 0.5, %v1115_v42 }
 0xf81   :  { %v1117_v43 = vsub.f32 1.5, %v1116_v33 }
 0xf82   :  { %v2301_v44 = vpop.eup %2300 }
 0xf83   :  { %v1118_v45 = vmul.f32 %v2299_v39, %v1117_v43  ;;  %v1124_v46 = vmul.f32 %v2301_v44, %v1112_v40  ;;  %vm1130_vm3 = vweird.f32 %v2301_v44 }
 0xf84   :  { %vm1131_vm6 = vmor %vm1129_vm4, %vm1130_vm3 }
 0xf85   :  { %v1125_v47 = vmul.f32 %v2301_v44, %v1124_v46  ;;  %v1122_v49 = vsel %vm1121_vm1, %v2299_v39, %v1118_v45 }
 0xf86   :  { %v1133_v51 = vmul.f32 %v1122_v49, %v1099_v22 }
 0xf87   :  { %v1126_v32 = vmul.f32 0.5, %v1125_v47 }
 0xf88   :  { %v1138_v56 = vmul.f32 %v2233_v50, %v1133_v51  ;;  %v2187_v51 = vld [vmem:[%s2981_s6 + $0x28] sm:$0xff] }
 0xf89   :  { %v1127_v34 = vsub.f32 1.5, %v1126_v32  ;;  %1353 = vmatpush.bf16.msra.mxu3 %v2187_v51 }
 0xf8a   :  { %v1143_v59 = vadd.f32 %v2234_v55, %v1138_v56 }
 0xf8b   :  { %v1128_v52 = vmul.f32 %v2301_v44, %v1127_v34 }
 0xf8d   :  { %v1132_v53 = vsel %vm1131_vm6, %v2301_v44, %v1128_v52 }
 0xf8e   :  { %v1134_v57 = vmul.f32 %v1132_v53, %v1100_v27 }
 0xf90   :  { %v1139_v58 = vmul.f32 %v2233_v50, %v1134_v57 }
 0xf92   :  { %v1144_v61 = vadd.f32 %v2234_v55, %v1139_v58  ;;  %v2186_v55 = vld [vmem:[%s2981_s6 + $0x20] sm:$0xff] }
 0xf93   :  { %1354 = vmatpush.bf16.msra.mxu3 %v2186_v55 }
 0xf94   :  { %v1145_v62 = vpack.c.bf16 %v1144_v61, %v1143_v59 }
 0xf96   :  { %2048 = vmatmul.msk.bf16.vlgmr.msra.gmra.mxu1 %vm132_vm2, %v1145_v62 }
0x1013   :  { %v1180_v4 = vpop.f32.mrf.mxu1 }
0x1014   :  { %v1181_v5 = vadd.f32 %v2235_v2, %v1180_v4 }
0x1016   :  { %v1185_v6 = vmul.f32 %v1181_v5, %v1181_v5 }
0x1018   :  { %v1187_v8 = vmul.f32 %v1185_v6, %v1181_v5 }
0x101a   :  { %v1189_v9 = vmul.f32 0.044715, %v1187_v8 }
0x101b   :  { %v1182_v10 = vpop.f32.mrf.mxu1 }
0x101c   :  { %v1191_v11 = vadd.f32 %v1189_v9, %v1181_v5  ;;  %v1183_v12 = vadd.f32 %v2235_v2, %v1182_v10  ;;  %v2237_v10 = vld [vmem:[%s2991_s16 + $0x1] ss:$0 sm:$0xff] }
0x101e   :  { %v1193_v15 = vmul.f32 0.7978846, %v1191_v11  ;;  %v1186_v16 = vmul.f32 %v1183_v12, %v1183_v12 }
0x1020   :  { %v1188_v17 = vmul.f32 %v1186_v16, %v1183_v12  ;;  %2302 = vtanh.f32 %v1193_v15  ;;  %v2238_v16 = vld [vmem:[%s2992_s17 + $0x1] ss:$0 sm:$0xff] }
0x1022   :  { %v1190_v18 = vmul.f32 0.044715, %v1188_v17 }
0x1024   :  { %v1192_v19 = vadd.f32 %v1190_v18, %v1183_v12 }
0x1026   :  { %v1194_v22 = vmul.f32 0.7978846, %v1192_v19  ;;  %v2303_v23 = vpop.eup %2302 }
0x1027   :  { %v1197_v24 = vadd.f32 1.0, %v2303_v23 }
0x1028   :  { %2304 = vtanh.f32 %v1194_v22 }
0x1029   :  { %v1199_v26 = vmul.f32 0.5, %v1197_v24 }
0x102b   :  { %v1201_v28 = vmul.f32 %v1199_v26, %v1181_v5  ;;  %v2239_v26 = vld [vmem:[%s2982_s7 + $0x2] ss:$0 sm:$0xff] }
0x102e   :  { %v2305_v25 = vpop.eup %2304 }
0x102f   :  { %v1198_v27 = vadd.f32 1.0, %v2305_v25 }
0x1031   :  { %v1200_v13 = vmul.f32 0.5, %v1198_v27 }
0x1033   :  { %v1202_v29 = vmul.f32 %v1200_v13, %v1183_v12 }
0x1035   :  { %v1203_v30 = vpack.c.bf16 %v1202_v29, %v1201_v28 }
0x1037   :  { %2074 = vmatmul.msk.bf16.vlgmr.msra.gmra.mxu2 %vm686_vm5, %v1203_v30 }
0x10ba   :  { %v1254_v31 = vpop.f32.mrf.mxu2 }
0x10bb   :  { %v1255_v35 = vadd.f32 %v2236_v14, %v1254_v31 }
0x10bd   :  { %v1259_v36 = vadd.f32 %v1255_v35, %v1143_v59 }
0x10bf   :  { %v1265_v37 = vsel %vm132_vm2, %v1259_v36, 0.0 }
0x10c0   :  { %1266 = vadd.xlane.f32.xlu0 %v1265_v37 }
0x10c2   :  { %v1256_v39 = vpop.f32.mrf.mxu2 }
0x10c3   :  { %v1257_v40 = vadd.f32 %v2236_v14, %v1256_v39 }
0x10c5   :  { %v1260_v41 = vadd.f32 %v1257_v40, %v1144_v61 }
0x10c7   :  { %v1268_v42 = vsel %vm132_vm2, %v1260_v41, 0.0 }
0x10c8   :  { %1269 = vadd.xlane.f32.xlu1 %v1268_v42 }
0x1133   :  { %v1267_v33 = vpop.xlane.xlu0 %1266 }
0x1134   :  { %v1271_v43 = vmul.f32 %v1267_v33, %v2532_v38 }
0x1136   :  { %v1273_v44 = vsub.f32 %v1259_v36, %v1271_v43 }
0x1138   :  { %v1275_v45 = vmul.f32 %v1273_v44, %v1273_v44 }
0x113a   :  { %v1277_v46 = vsel %vm132_vm2, %v1275_v45, 0.0 }
0x113b   :  { %v1270_v47 = vpop.xlane.xlu1 %1269  ;;  %1278 = vadd.xlane.f32.xlu0 %v1277_v46 }
0x113c   :  { %v1272_v49 = vmul.f32 %v1270_v47, %v2532_v38 }
0x113e   :  { %v1274_v32 = vsub.f32 %v1260_v41, %v1272_v49 }
0x1140   :  { %v1276_v34 = vmul.f32 %v1274_v32, %v1274_v32 }
0x1142   :  { %v1280_v50 = vsel %vm132_vm2, %v1276_v34, 0.0 }
0x1143   :  { %1281 = vadd.xlane.f32.xlu1 %v1280_v50 }
0x11ae   :  { %v1279_v52 = vpop.xlane.xlu0 %1278 }
0x11af   :  { %v1283_v53 = vmul.f32 %v1279_v52, %v2532_v38 }
0x11b1   :  { %v1285_v56 = vadd.f32 1e-12, %v1283_v53 }
0x11b3   :  { %2306 = vrsqrt.f32 %v1285_v56  ;;  %vm1293_vm8 = vweird.f32 %v1285_v56 }
0x11b6   :  { %v1282_v57 = vpop.xlane.xlu1 %1281 }
0x11b7   :  { %v1284_v58 = vmul.f32 %v1282_v57, %v2532_v38 }
0x11b9   :  { %v2307_v59 = vpop.eup %2306  ;;  %v1286_v61 = vadd.f32 1e-12, %v1284_v58 }
0x11ba   :  { %v1288_v62 = vmul.f32 %v2307_v59, %v1285_v56  ;;  %vm1294_vm7 = vweird.f32 %v2307_v59 }
0x11bb   :  { %2308 = vrsqrt.f32 %v1286_v61  ;;  %vm1295_vm9 = vmor %vm1293_vm8, %vm1294_vm7  ;;  %vm1303_vm14 = vweird.f32 %v1286_v61 }
0x11bc   :  { %v1289_v63 = vmul.f32 %v2307_v59, %v1288_v62 }
0x11be   :  { %v1290_v0 = vmul.f32 0.5, %v1289_v63 }
0x11c0   :  { %v1291_v1 = vsub.f32 1.5, %v1290_v0 }
0x11c1   :  { %v2309_v2 = vpop.eup %2308 }
0x11c2   :  { %v1292_v3 = vmul.f32 %v2307_v59, %v1291_v1  ;;  %v1298_v4 = vmul.f32 %v2309_v2, %v1286_v61  ;;  %vm1304_vm11 = vweird.f32 %v2309_v2 }
0x11c3   :  { %vm1305_vm15 = vmor %vm1303_vm14, %vm1304_vm11  ;;  %vm1893_vm11 = vcmask 1041409  }
0x11c4   :  { %v1299_v5 = vmul.f32 %v2309_v2, %v1298_v4  ;;  %v1296_v6 = vsel %vm1295_vm9, %v2307_v59, %v1292_v3 }
0x11c5   :  { %v1307_v11 = vmul.f32 %v1296_v6, %v1273_v44 }
0x11c6   :  { %v1300_v8 = vmul.f32 0.5, %v1299_v5 }
0x11c7   :  { %v1312_v17 = vmul.f32 %v2237_v10, %v1307_v11 }
0x11c8   :  { %v1301_v9 = vsub.f32 1.5, %v1300_v8 }
0x11c9   :  { %v2832_v22 = vadd.f32 %v2238_v16, %v1312_v17 }
0x11ca   :  { %v1302_v12 = vmul.f32 %v2309_v2, %v1301_v9 }
0x11cc   :  { %v1306_v15 = vsel %vm1305_vm15, %v2309_v2, %v1302_v12 }
0x11cd   :  { %v1308_v18 = vmul.f32 %v1306_v15, %v1274_v32 }
0x11cf   :  { %v1313_v19 = vmul.f32 %v2237_v10, %v1308_v18 }
0x11d1   :  { %v2834_v23 = vadd.f32 %v2238_v16, %v1313_v19 }
0x11d3   :  { %v1321_v24 = vpack.c.bf16 %v2834_v23, %v2832_v22 }
0x11d5   :  { %2090 = vmatmul.msk.bf16.vlgmr.msra.gmra.mxu3 %vm132_vm2, %v1321_v24 }
0x1258   :  { %v1356_v25 = vpop.f32.mrf.mxu3 }
0x1259   :  { %v1357_v27 = vadd.f32 %v2239_v26, %v1356_v25 }
0x125b   :  { %v1361_v28 = vpack.c.bf16 %v1357_v27, %v1357_v27 }
0x125d   :  { %v1365_v14 = vunpack.c.l.b16 %v1361_v28 }
0x125f   :  { %v2843_v36 = vpack.c.b16 %v1365_v14, %v1365_v14 }
0x1260   :  { %v1358_v13 = vpop.f32.mrf.mxu3 }
0x1261   :  { %v1359_v29 = vadd.f32 %v2239_v26, %v1358_v13 }
0x1263   :  { %v1362_v30 = vpack.c.bf16 %v1359_v29, %v1359_v29 }
0x1265   :  { %v1366_v31 = vunpack.c.l.b16 %v1362_v30 }
0x1267   :  { %v1367_v35 = vpack.c.b16 %v1366_v31, %v1365_v14  ;;  %v1373_v44 = vpack.c.b16 %v1366_v31, %v1366_v31 }
0x1269   :  { %1368 = vrot.lane.b32.xlu2 %v1367_v35, %s2367_s26 }
0x1271   :  { %1376 = vrot.lane.b32.xlu2 %v2843_v36, %s2366_s5 }
0x12c3   :  { %v1369_v37 = vpop.permute.xlu2 %1368 }
0x12c4   :  { %v1370_v39 = vunpack.c.l.b16 %v1369_v37  ;;  %v1371_v40 = vunpack.c.h.b16 %v1369_v37 }
0x12c6   :  { %v1374_v41 = vpack.c.b16 %v1370_v39, %v1370_v39  ;;  %v2847_v42 = vpack.c.b16 %v1371_v40, %v1371_v40 }
0x12c8   :  { %1439 = vrot.lane.b32.xlu1 %v2847_v42, %s2366_s5  ;;  %1418 = vrot.lane.b32.xlu0 %v1374_v41, %s2366_s5 }
0x12cb   :  { %v1377_v33 = vpop.permute.xlu2 %1376 }
0x12cc   :  { %v1382_v43 = vsel %vm270_vm10, %v1377_v33, 0 }
0x12cd   :  { %1391 = vmatpush.bf16.xpose.msrb.mxu0 %v1382_v43 }
0x12d0   :  { %1397 = vrot.lane.b32.xlu0 %v1373_v44, %s2366_s5 }
0x12d4   :  { %2091 = vmatmul.msk.bf16.vlgmr.msrb.gmra.mxu0 %vm270_vm10, %v2843_v36 }
0x133a   :  { %v1440_v45 = vpop.permute.xlu1 %1439  ;;  %v1419_v46 = vpop.permute.xlu0 %1418 }
0x133b   :  { %v1445_v47 = vsel %vm270_vm10, %v1440_v45, 0  ;;  %v1424_v49 = vsel %vm270_vm10, %v1419_v46, 0 }
0x133c   :  { %1433 = vmatpush.bf16.xpose.msrb.mxu2 %v1424_v49  ;;  %1454 = vmatpush.bf16.xpose.msrb.mxu3 %v1445_v47 }
0x1342   :  { %v1398_v32 = vpop.permute.xlu0 %1397 }
0x1343   :  { %v1403_v34 = vsel %vm270_vm10, %v1398_v32, 0  ;;  %2093 = vmatmul.msk.bf16.vlgmr.msrb.gmra.mxu2 %vm270_vm10, %v1374_v41  ;;  %2094 = vmatmul.msk.bf16.vlgmr.msrb.gmra.mxu3 %vm270_vm10, %v2847_v42 }
0x1344   :  { %1412 = vmatpush.bf16.xpose.msrb.mxu1 %v1403_v34 }
0x134b   :  { %2092 = vmatmul.msk.bf16.vlgmr.msrb.gmra.mxu1 %vm270_vm10, %v1373_v44 }
0x1351   :  { %v1393_v50 = vpop.f32.mrf.mxu0 }
0x1352   :  { %v1394_v51 = vadd.f32 %v1393_v50, %v2588_v48 }
0x1354   :  { %v1460_v52 = vsel %vm353_vm12, %v1394_v51, -inf }
0x1355   :  { %1461 = vmax.xlane.f32.xlu0 %v1460_v52 }
0x1359   :  { %v1395_v53 = vpop.f32.mrf.mxu0 }
0x13c6   :  { %v1435_v55 = vpop.f32.mrf.mxu2  ;;  %v1456_v56 = vpop.f32.mrf.mxu3 }
0x13c7   :  { %v1436_v57 = vadd.f32 %v1435_v55, %v2599_v60  ;;  %v1457_v58 = vadd.f32 %v1456_v56, %v2595_v54 }
0x13c8   :  { %v1414_v59 = vpop.f32.mrf.mxu1  ;;  %v1462_v54 = vpop.xlane.xlu0 %1461 }
0x13c9   :  { %v1469_v61 = vsel %vm353_vm12, %v1457_v58, -inf  ;;  %v1466_v62 = vsel %vm353_vm12, %v1436_v57, -inf  ;;  %v1415_v63 = vadd.f32 %v1414_v59, %v2604_v7  ;;  %v1472_v6 = vsub.f32 %v1394_v51, %v1462_v54  ;;  %v2189_v51 = vld [vmem:[%s2983_s8 + $0x28] sm:$0xff] }
0x13ca   :  { %1470 = vmax.xlane.f32.xlu1 %v1469_v61  ;;  %1467 = vmax.xlane.f32.xlu2 %v1466_v62 }
0x13cb   :  { %v1463_v2 = vsel %vm353_vm12, %v1415_v63, -inf  ;;  %v1476_v7 = vmul.f32 1.442695, %v1472_v6 }
0x13ce   :  { %v1437_v48 = vpop.f32.mrf.mxu2  ;;  %v1458_v0 = vpop.f32.mrf.mxu3 }
0x13d0   :  { %v1416_v1 = vpop.f32.mrf.mxu1 }
0x13d2   :  { %1464 = vmax.xlane.f32.xlu2 %v1463_v2 }
0x13ea   :  { %1550 = vrot.lane.b32.xlu2 %v1374_v41, %s2368_s23 }
0x13f2   :  { %1529 = vrot.lane.b32.xlu2 %v1373_v44, %s2368_s23 }
0x143d   :  { %v1471_v60 = vpop.xlane.xlu1 %1470  ;;  %v1468_v3 = vpop.xlane.xlu2 %1467 }
0x143e   :  { %v1475_v4 = vsub.f32 %v1457_v58, %v1471_v60  ;;  %v1474_v5 = vsub.f32 %v1436_v57, %v1468_v3  ;;  %v2240_v3 = vld [vmem:[%s2984_s9 + $0x2] ss:$0 sm:$0xff]  ;;  %s2370_s9 = smov [#allocation2]  }
0x143f   :  { %s1930_s29 = sshll.u32 %s2370_s9, 4  ;;  %s1931_s29 = int_to_ptr.vmem [resolvable:$true] %s1930_s29 }
0x1440   :  { %v1482_v8 = vmul.f32 1.442695, %v1475_v4  ;;  %v1480_v9 = vmul.f32 1.442695, %v1474_v5 }
0x1442   :  { %2310 = vpow2.f32 %v1482_v8 }
0x1443   :  { %2312 = vpow2.f32 %v1480_v9 }
0x1444   :  { %2314 = vpow2.f32 %v1476_v7 }
0x1445   :  { %v1465_v10 = vpop.xlane.xlu2 %1464 }
0x1446   :  { %v1473_v12 = vsub.f32 %v1415_v63, %v1465_v10  ;;  %v2188_v63 = vld [vmem:[%s2983_s8 + $0x20] sm:$0xff] }
0x1448   :  { %v2311_v11 = vpop.eup %2310  ;;  %v1478_v18 = vmul.f32 1.442695, %v1473_v12 }
0x1449   :  { %v2313_v15 = vpop.eup %2312  ;;  %v1493_v16 = vsel %vm353_vm12, %v2311_v11, 0.0 }
0x144a   :  { %1494 = vadd.xlane.f32.xlu0 %v1493_v16  ;;  %v1490_v17 = vsel %vm353_vm12, %v2313_v15, 0.0  ;;  %v2315_v24 = vpop.eup %2314  ;;  %2316 = vpow2.f32 %v1478_v18 }
0x144b   :  { %1491 = vadd.xlane.f32.xlu1 %v1490_v17  ;;  %v1484_v26 = vsel %vm353_vm12, %v2315_v24, 0.0 }
0x144d   :  { %v1551_v19 = vpop.permute.xlu2 %1550 }
0x144e   :  { %v1556_v25 = vsel %vm407_vm13, %v1551_v19, 0 }
0x144f   :  { %1565 = vmatpush.bf16.msra.mxu2 %v1556_v25 }
0x1450   :  { %v2317_v13 = vpop.eup %2316 }
0x1451   :  { %v1487_v29 = vsel %vm353_vm12, %v2317_v13, 0.0 }
0x1452   :  { %1485 = vadd.xlane.f32.xlu0 %v1484_v26 }
0x1455   :  { %v1530_v27 = vpop.permute.xlu2 %1529 }
0x1456   :  { %v1535_v28 = vsel %vm407_vm13, %v1530_v27, 0 }
0x1457   :  { %1544 = vmatpush.bf16.msra.mxu1 %v1535_v28 }
0x145a   :  { %1488 = vadd.xlane.f32.xlu0 %v1487_v29 }
0x1464   :  { %1571 = vrot.lane.b32.xlu1 %v2847_v42, %s2368_s23 }
0x146e   :  { %1508 = vrot.lane.b32.xlu0 %v2843_v36, %s2368_s23 }
0x14bd   :  { %v1495_v30 = vpop.xlane.xlu0 %1494 }
0x14be   :  { %v1492_v14 = vpop.xlane.xlu1 %1491 }
0x14bf   :  { %2318 = vrcp.f32 %v1492_v14 }
0x14c0   :  { %2320 = vrcp.f32 %v1495_v30  ;;  %v2190_v30 = vld [vmem:[%s2987_s12 + $0x20] sm:$0xff] }
0x14c5   :  { %v2319_v31 = vpop.eup %2318  ;;  %v1486_v35 = vpop.xlane.xlu0 %1485 }
0x14c6   :  { %v1502_v37 = vmul.f32 %v2319_v31, %v2313_v15  ;;  %v2321_v41 = vpop.eup %2320 }
0x14c7   :  { %v1503_v43 = vmul.f32 %v2321_v41, %v2311_v11 }
0x14c8   :  { %v1506_v39 = vpack.c.bf16 %v1502_v37, %v1502_v37 }
0x14c9   :  { %v1507_v46 = vpack.c.bf16 %v1503_v43, %v1503_v43 }
0x14ca   :  { %2097 = vmatmul.msk.bf16.vlgmr.msra.gmra.mxu2 %vm353_vm12, %v1506_v39 }
0x14cd   :  { %v1489_v40 = vpop.xlane.xlu0 %1488 }
0x14ce   :  { %2322 = vrcp.f32 %v1489_v40 }
0x14cf   :  { %2324 = vrcp.f32 %v1486_v35 }
0x14d4   :  { %v2323_v33 = vpop.eup %2322 }
0x14d5   :  { %v1501_v44 = vmul.f32 %v2323_v33, %v2317_v13  ;;  %v2325_v47 = vpop.eup %2324  ;;  %v2191_v13 = vld [vmem:[%s2987_s12 + $0x28] sm:$0xff] }
0x14d6   :  { %v1572_v42 = vpop.permute.xlu1 %1571  ;;  %v1500_v49 = vmul.f32 %v2325_v47, %v2315_v24  ;;  %1734 = vmatpush.bf16.msrb.mxu1 %v2191_v13  ;;  %v2244_v13 = vld [vmem:[%s2990_s15 + $0x2] ss:$0 sm:$0xff] }
0x14d7   :  { %v1505_v45 = vpack.c.bf16 %v1501_v44, %v1501_v44  ;;  %v1577_v36 = vsel %vm407_vm13, %v1572_v42, 0 }
0x14d8   :  { %1586 = vmatpush.bf16.msra.mxu3 %v1577_v36  ;;  %v1504_v50 = vpack.c.bf16 %v1500_v49, %v1500_v49 }
0x14d9   :  { %2096 = vmatmul.msk.bf16.vlgmr.msra.gmra.mxu1 %vm353_vm12, %v1505_v45 }
0x14da   :  { %1735 = vmatpush.bf16.msrb.mxu1 %v2190_v30 }
0x14db   :  { %2098 = vmatmul.msk.bf16.vlgmr.msra.gmra.mxu3 %vm353_vm12, %v1507_v46 }
0x14e0   :  { %v1509_v32 = vpop.permute.xlu0 %1508 }
0x14e1   :  { %v1514_v34 = vsel %vm407_vm13, %v1509_v32, 0  ;;  %v2241_v32 = vld [vmem:[%s2985_s10 + $0x2] ss:$0 sm:$0xff] }
0x14e2   :  { %1523 = vmatpush.bf16.msra.mxu0 %v1514_v34 }
0x14e5   :  { %2095 = vmatmul.msk.bf16.vlgmr.msra.gmra.mxu0 %vm353_vm12, %v1504_v50 }
0x14e6   :  { %1634 = vmatpush.bf16.msrb.mxu0 %v2189_v51 }
0x14ea   :  { %1635 = vmatpush.bf16.msrb.mxu0 %v2188_v63  ;;  %v2193_v63 = vld [vmem:[%s2989_s14 + $0x48] sm:$0xff] }
0x154d   :  { %v1567_v52 = vpop.f32.mrf.mxu2 }
0x1555   :  { %v1569_v53 = vpop.f32.mrf.mxu2 }
0x1556   :  { %v1546_v55 = vpop.f32.mrf.mxu1 }
0x155e   :  { %v1588_v56 = vpop.f32.mrf.mxu3  ;;  %v1548_v57 = vpop.f32.mrf.mxu1 }
0x155f   :  { %v2216_v58 = vpack.i.bf16 %v1588_v56, %v1567_v52  ;;  %v2242_v52 = vld [vmem:[%s2986_s11 + $0x2] ss:$0 sm:$0xff] }
0x1561   :  { %2217 = vrot.lane.b32.xlu1 %v2216_v58, %s2369_s0 }
0x1562   :  { %v1525_v59 = vpop.f32.mrf.mxu0 }
0x1566   :  { %v1590_v61 = vpop.f32.mrf.mxu3 }
0x1567   :  { %v2195_v61 = vld [vmem:[%s2989_s14 + $0x58] sm:$0xff] }
0x1568   :  { %1806 = vmatpush.bf16.msrb.mxu2 %v2195_v61 }
0x156a   :  { %v1527_v62 = vpop.f32.mrf.mxu0 }
0x156b   :  { %v2194_v62 = vld [vmem:[%s2989_s14 + $0x50] sm:$0xff] }
0x156c   :  { %1807 = vmatpush.bf16.msrb.mxu2 %v2194_v62 }
0x1570   :  { %1808 = vmatpush.bf16.msrb.mxu2 %v2193_v63 }
0x15d3   :  { %v2218_v48 = vpop.permute.xlu1 %2217 }
0x15d4   :  { %v2220_v0 = vunpack.i.h.bf16 %v2218_v48  ;;  %v2219_v1 = vunpack.i.l.bf16 %v2218_v48  ;;  %v2243_v48 = vld [vmem:[%s2988_s13 + $0x2] ss:$0 sm:$0xff] }
0x15d6   :  { %v1600_v2 = vsel %vm270_vm10, %v1525_v59, %v2219_v1  ;;  %v1601_v54 = vsel %vm270_vm10, %v1546_v55, %v2220_v0  ;;  %v2192_v0 = vld [vmem:[%s2989_s14 + $0x40] sm:$0xff] }
0x15d7   :  { %v1602_v60 = vpack.c.bf16 %v1601_v54, %v1600_v2  ;;  %1809 = vmatpush.bf16.msrb.mxu2 %v2192_v0 }
0x15d9   :  { %2112 = vmatmul.msk.bf16.vlgmr.msrb.gmra.mxu0 %vm132_vm2, %v1602_v60 }
0x1656   :  { %v1637_v4 = vpop.f32.mrf.mxu0 }
0x1657   :  { %v1638_v5 = vadd.f32 %v2240_v3, %v1637_v4 }
0x1659   :  { %v1642_v6 = vadd.f32 %v1638_v5, %v2832_v22 }
0x165b   :  { %v1648_v8 = vsel %vm132_vm2, %v1642_v6, 0.0 }
0x165c   :  { %1649 = vadd.xlane.f32.xlu2 %v1648_v8 }
0x165e   :  { %v1639_v9 = vpop.f32.mrf.mxu0 }
0x165f   :  { %v1640_v7 = vadd.f32 %v2240_v3, %v1639_v9 }
0x1661   :  { %v1643_v10 = vadd.f32 %v1640_v7, %v2834_v23 }
0x1663   :  { %v1651_v11 = vsel %vm132_vm2, %v1643_v10, 0.0 }
0x1664   :  { %1652 = vadd.xlane.f32.xlu1 %v1651_v11 }
0x16cf   :  { %v1650_v12 = vpop.xlane.xlu2 %1649 }
0x16d0   :  { %v1654_v15 = vmul.f32 %v1650_v12, %v2532_v38 }
0x16d2   :  { %v1656_v16 = vsub.f32 %v1642_v6, %v1654_v15 }
0x16d4   :  { %v1658_v17 = vmul.f32 %v1656_v16, %v1656_v16 }
0x16d6   :  { %v1660_v18 = vsel %vm132_vm2, %v1658_v17, 0.0 }
0x16d7   :  { %v1653_v19 = vpop.xlane.xlu1 %1652  ;;  %1661 = vadd.xlane.f32.xlu0 %v1660_v18 }
0x16d8   :  { %v1655_v24 = vmul.f32 %v1653_v19, %v2532_v38 }
0x16da   :  { %v1657_v25 = vsub.f32 %v1643_v10, %v1655_v24 }
0x16dc   :  { %v1659_v26 = vmul.f32 %v1657_v25, %v1657_v25 }
0x16de   :  { %v1663_v27 = vsel %vm132_vm2, %v1659_v26, 0.0 }
0x16df   :  { %1664 = vadd.xlane.f32.xlu2 %v1663_v27 }
0x174a   :  { %v1662_v28 = vpop.xlane.xlu0 %1661 }
0x174b   :  { %v1666_v29 = vmul.f32 %v1662_v28, %v2532_v38 }
0x174d   :  { %v1668_v14 = vadd.f32 1e-12, %v1666_v29 }
0x174f   :  { %2326 = vrsqrt.f32 %v1668_v14  ;;  %vm1676_vm12 = vweird.f32 %v1668_v14 }
0x1752   :  { %v1665_v31 = vpop.xlane.xlu2 %1664 }
0x1753   :  { %v1667_v35 = vmul.f32 %v1665_v31, %v2532_v38 }
0x1755   :  { %v2327_v37 = vpop.eup %2326  ;;  %v1669_v39 = vadd.f32 1e-12, %v1667_v35 }
0x1756   :  { %v1671_v40 = vmul.f32 %v2327_v37, %v1668_v14  ;;  %vm1677_vm10 = vweird.f32 %v2327_v37 }
0x1757   :  { %2328 = vrsqrt.f32 %v1669_v39  ;;  %vm1678_vm13 = vmor %vm1676_vm12, %vm1677_vm10  ;;  %vm1686_vm1 = vweird.f32 %v1669_v39 }
0x1758   :  { %v1672_v41 = vmul.f32 %v2327_v37, %v1671_v40 }
0x175a   :  { %v1673_v33 = vmul.f32 0.5, %v1672_v41 }
0x175c   :  { %v1674_v43 = vsub.f32 1.5, %v1673_v33 }
0x175d   :  { %v2329_v44 = vpop.eup %2328 }
0x175e   :  { %v1675_v42 = vmul.f32 %v2327_v37, %v1674_v43  ;;  %v1681_v45 = vmul.f32 %v2329_v44, %v1669_v39  ;;  %vm1687_vm0 = vweird.f32 %v2329_v44 }
0x175f   :  { %vm1688_vm3 = vmor %vm1686_vm1, %vm1687_vm0 }
0x1760   :  { %v1682_v36 = vmul.f32 %v2329_v44, %v1681_v45  ;;  %v1679_v46 = vsel %vm1678_vm13, %v2327_v37, %v1675_v42 }
0x1761   :  { %v1690_v34 = vmul.f32 %v1679_v46, %v1656_v16 }
0x1762   :  { %v1683_v47 = vmul.f32 0.5, %v1682_v36 }
0x1763   :  { %v1695_v53 = vmul.f32 %v2241_v32, %v1690_v34 }
0x1764   :  { %v1684_v49 = vsub.f32 1.5, %v1683_v47 }
0x1765   :  { %v1700_v57 = vadd.f32 %v2242_v52, %v1695_v53  ;;  %v2196_v53 = vld [vmem:[%s2993_s18] sm:$0xff] }
0x1766   :  { %v1685_v50 = vmul.f32 %v2329_v44, %v1684_v49 }
0x1768   :  { %v1689_v51 = vsel %vm1688_vm3, %v2329_v44, %v1685_v50  ;;  %v2197_v50 = vld [vmem:[%s2993_s18 + $0x8] sm:$0xff] }
0x1769   :  { %v1691_v55 = vmul.f32 %v1689_v51, %v1657_v25  ;;  %1917 = vmatpush.bf16.msrb.mxu3 %v2197_v50 }
0x176b   :  { %v1696_v56 = vmul.f32 %v2241_v32, %v1691_v55 }
0x176d   :  { %v1701_v58 = vadd.f32 %v2242_v52, %v1696_v56  ;;  %1918 = vmatpush.bf16.msrb.mxu3 %v2196_v53 }
0x176f   :  { %v1702_v59 = vpack.c.bf16 %v1701_v58, %v1700_v57 }
0x1771   :  { %2128 = vmatmul.msk.bf16.vlgmr.msrb.gmra.mxu1 %vm132_vm2, %v1702_v59 }
0x17ee   :  { %v1737_v1 = vpop.f32.mrf.mxu1 }
0x17ef   :  { %v1738_v2 = vadd.f32 %v2243_v48, %v1737_v1  ;;  %v2245_v1 = vld [vmem:[%s2991_s16 + $0x2] ss:$0 sm:$0xff] }
0x17f1   :  { %v1742_v54 = vmul.f32 %v1738_v2, %v1738_v2 }
0x17f3   :  { %v1744_v60 = vmul.f32 %v1742_v54, %v1738_v2 }
0x17f5   :  { %v1746_v3 = vmul.f32 0.044715, %v1744_v60 }
0x17f6   :  { %v1739_v4 = vpop.f32.mrf.mxu1 }
0x17f7   :  { %v1748_v5 = vadd.f32 %v1746_v3, %v1738_v2  ;;  %v1740_v6 = vadd.f32 %v2243_v48, %v1739_v4  ;;  %v2246_v3 = vld [vmem:[%s2992_s17 + $0x2] ss:$0 sm:$0xff] }
0x17f9   :  { %v1750_v8 = vmul.f32 0.7978846, %v1748_v5  ;;  %v1743_v9 = vmul.f32 %v1740_v6, %v1740_v6 }
0x17fb   :  { %v1745_v7 = vmul.f32 %v1743_v9, %v1740_v6  ;;  %2330 = vtanh.f32 %v1750_v8 }
0x17fd   :  { %v1747_v10 = vmul.f32 0.044715, %v1745_v7  ;;  %v1319_v7 = vadd.f32 %v2832_v22, %v2700_v20  ;;  %v2247_v20 = vld [vmem:[%s2994_s19] ss:$0 sm:$0xff] }
0x17ff   :  { %v1749_v11 = vadd.f32 %v1747_v10, %v1740_v6 }
0x1801   :  { %v1751_v12 = vmul.f32 0.7978846, %v1749_v11  ;;  %v2331_v15 = vpop.eup %2330 }
0x1802   :  { %v1754_v16 = vadd.f32 1.0, %v2331_v15 }
0x1803   :  { %2332 = vtanh.f32 %v1751_v12  ;;  %v1320_v12 = vadd.f32 %v2834_v23, %v2702_v21 }
0x1804   :  { %v1756_v18 = vmul.f32 0.5, %v1754_v16 }
0x1806   :  { %v1758_v25 = vmul.f32 %v1756_v18, %v1738_v2 }
0x1809   :  { %v2333_v17 = vpop.eup %2332 }
0x180a   :  { %v1755_v19 = vadd.f32 1.0, %v2333_v17 }
0x180c   :  { %v1757_v24 = vmul.f32 0.5, %v1755_v19 }
0x180e   :  { %v1759_v26 = vmul.f32 %v1757_v24, %v1740_v6 }
0x1810   :  { %v1760_v27 = vpack.c.bf16 %v1759_v26, %v1758_v25 }
0x1812   :  { %2154 = vmatmul.msk.bf16.vlgmr.msrb.gmra.mxu2 %vm686_vm5, %v1760_v27 }
0x1895   :  { %v1811_v28 = vpop.f32.mrf.mxu2 }
0x1896   :  { %v1812_v29 = vadd.f32 %v2244_v13, %v1811_v28 }
0x1898   :  { %v1816_v30 = vadd.f32 %v1812_v29, %v1700_v57 }
0x189a   :  { %v1822_v14 = vsel %vm132_vm2, %v1816_v30, 0.0 }
0x189b   :  { %1823 = vadd.xlane.f32.xlu2 %v1822_v14 }
0x189d   :  { %v1813_v31 = vpop.f32.mrf.mxu2 }
0x189e   :  { %v1814_v35 = vadd.f32 %v2244_v13, %v1813_v31 }
0x18a0   :  { %v1817_v37 = vadd.f32 %v1814_v35, %v1701_v58 }
0x18a2   :  { %v1825_v39 = vsel %vm132_vm2, %v1817_v37, 0.0 }
0x18a3   :  { %1826 = vadd.xlane.f32.xlu1 %v1825_v39 }
0x190e   :  { %v1824_v40 = vpop.xlane.xlu2 %1823 }
0x190f   :  { %v1828_v41 = vmul.f32 %v1824_v40, %v2532_v38 }
0x1911   :  { %v1830_v33 = vsub.f32 %v1816_v30, %v1828_v41 }
0x1913   :  { %v1832_v43 = vmul.f32 %v1830_v33, %v1830_v33 }
0x1915   :  { %v1834_v44 = vsel %vm132_vm2, %v1832_v43, 0.0 }
0x1916   :  { %v1827_v42 = vpop.xlane.xlu1 %1826  ;;  %1835 = vadd.xlane.f32.xlu1 %v1834_v44 }
0x1917   :  { %v1829_v45 = vmul.f32 %v1827_v42, %v2532_v38 }
0x1919   :  { %v1831_v36 = vsub.f32 %v1817_v37, %v1829_v45 }
0x191b   :  { %v1833_v46 = vmul.f32 %v1831_v36, %v1831_v36 }
0x191d   :  { %v1837_v47 = vsel %vm132_vm2, %v1833_v46, 0.0 }
0x191e   :  { %1838 = vadd.xlane.f32.xlu0 %v1837_v47 }
0x1989   :  { %v1836_v49 = vpop.xlane.xlu1 %1835 }
0x198a   :  { %v1840_v32 = vmul.f32 %v1836_v49, %v2532_v38 }
0x198c   :  { %v1842_v34 = vadd.f32 1e-12, %v1840_v32 }
0x198e   :  { %2334 = vrsqrt.f32 %v1842_v34  ;;  %vm1850_vm4 = vweird.f32 %v1842_v34 }
0x1991   :  { %v1839_v51 = vpop.xlane.xlu0 %1838 }
0x1992   :  { %v1841_v52 = vmul.f32 %v1839_v51, %v2532_v38 }
0x1994   :  { %v2335_v55 = vpop.eup %2334  ;;  %v1843_v56 = vadd.f32 1e-12, %v1841_v52 }
0x1995   :  { %v1845_v57 = vmul.f32 %v2335_v55, %v1842_v34  ;;  %vm1851_vm5 = vweird.f32 %v2335_v55 }
0x1996   :  { %2336 = vrsqrt.f32 %v1843_v56  ;;  %vm1852_vm6 = vmor %vm1850_vm4, %vm1851_vm5  ;;  %vm1860_vm8 = vweird.f32 %v1843_v56 }
0x1997   :  { %v1846_v58 = vmul.f32 %v2335_v55, %v1845_v57 }
0x1999   :  { %v1847_v59 = vmul.f32 0.5, %v1846_v58 }
0x199b   :  { %v1848_v61 = vsub.f32 1.5, %v1847_v59 }
0x199c   :  { %v2337_v62 = vpop.eup %2336 }
0x199d   :  { %v1849_v63 = vmul.f32 %v2335_v55, %v1848_v61  ;;  %v1855_v48 = vmul.f32 %v2337_v62, %v1843_v56  ;;  %vm1861_vm7 = vweird.f32 %v2337_v62 }
0x199e   :  { %vm1862_vm9 = vmor %vm1860_vm8, %vm1861_vm7 }
0x199f   :  { %v1853_v38 = vsel %vm1852_vm6, %v2335_v55, %v1849_v63  ;;  %v1856_v0 = vmul.f32 %v2337_v62, %v1855_v48 }
0x19a0   :  { %v1864_v2 = vmul.f32 %v1853_v38, %v1830_v33 }
0x19a1   :  { %v1857_v54 = vmul.f32 0.5, %v1856_v0 }
0x19a2   :  { %v1869_v4 = vmul.f32 %v2245_v1, %v1864_v2 }
0x19a3   :  { %v1858_v60 = vsub.f32 1.5, %v1857_v54 }
0x19a4   :  { %v1874_v8 = vadd.f32 %v2246_v3, %v1869_v4 }
0x19a5   :  { %v1859_v5 = vmul.f32 %v2337_v62, %v1858_v60 }
0x19a6   :  { %v1876_v11 = vadd.f32 %v1874_v8, %v1319_v7 }
0x19a7   :  { %v1863_v6 = vsel %vm1862_vm9, %v2337_v62, %v1859_v5 }
0x19a8   :  { %v1865_v9 = vmul.f32 %v1863_v6, %v1831_v36  ;;  %v1878_v17 = vpack.c.bf16 %v1876_v11, %v1876_v11 }
0x19aa   :  { %v1870_v10 = vmul.f32 %v2245_v1, %v1865_v9  ;;  %v1890_v24 = vunpack.c.l.b16 %v1878_v17 }
0x19ac   :  { %v1875_v15 = vadd.f32 %v2246_v3, %v1870_v10 }
0x19ae   :  { %v1877_v16 = vadd.f32 %v1875_v15, %v1320_v12 }
0x19b0   :  { %v1879_v18 = vpack.c.bf16 %v1877_v16, %v1877_v16 }
0x19b2   :  { %v1891_v19 = vunpack.c.l.b16 %v1879_v18 }
0x19b4   :  { %v1892_v25 = vrot.slane %v1891_v19, 7 }
0x19b6   :  { %v1894_v26 = vsel %vm1893_vm11, %v1892_v25, %v1890_v24 }
0x19b7   :  { %v1895_v27 = vpack.c.b16 %v1894_v26, %v1894_v26 }
0x19b9   :  { %2165 = vmatmul.msk.bf16.vlgmr.msrb.gmra.mxu3 %vm132_vm2, %v1895_v27 }
0x1a3c   :  { %v1920_v21 = vpop.f32.mrf.mxu3 }
0x1a3d   :  { %v1921_v22 = vadd.f32 %v2247_v20, %v1920_v21 }
0x1a3f   :  { %1924 = vst [vmem:[#allocation2] sm:$0x3] %v1921_v22 }
0x1a40   :  { %1935 = dma.vmem_to_hbm [thread:$0]  %s1931_s29, 32, %s1933_s21, [#allocation3]  }
0x1a44   :  { %v1922_v23 = vpop.f32.mrf.mxu3 }
0x1a45   :  { %2362 = dma.done.wait [#allocation3], 32  }
0x1a46   :  { %2363 = vsyncadd [#allocation3], 4294967264 }
0x1a47   :  { %1940 = vsyncpa [#allocation3], 1 }

</bundles_post_ra>
